<compile_context>
chip_gen: v6e
topology: v6e:2x2x1
jax: 0.10.0
libtpu: 0.0.40
codegen_flags: <defaults>
</compile_context>

<pallas_src>
import jax
import jax.numpy as jnp
from jax.experimental import pallas as pl
from jax.experimental.pallas import tpu as pltpu


# ------------------------------ Pallas kernel -------------------------------

def _make_fused_lstm_kernel(num_layers, T, B, H):
    """Builds the fused multi-layer-LSTM + FC kernel for a static config."""

    def kernel(*args):
        # args: x_ref, (wih_t, whh_t, b) * num_layers, fc_wt, fc_b,
        #       out_ref, gx_scr, seq_scr
        x_ref = args[0]
        w_refs = args[1:1 + 3 * num_layers]
        fc_wt_ref = args[1 + 3 * num_layers]
        fc_b_ref = args[2 + 3 * num_layers]
        out_ref = args[3 + 3 * num_layers]
        gx_scr = args[4 + 3 * num_layers]     # (T*B, 4H) hoisted input gates
        seq_scr = args[5 + 3 * num_layers]    # (T*B, H) inter-layer hidden seq

        h = None
        for layer in range(num_layers):
            wih_t = w_refs[3 * layer][...]        # (Din_l, 4H)
            whh_t = w_refs[3 * layer + 1][...]    # (H, 4H)
            bias = w_refs[3 * layer + 2][...]     # (1, 4H)

            # Layer input, time-major flattened to (T*B, Din_l): original
            # sequence for layer 0, previous layer's hidden sequence else.
            inp = x_ref[...] if layer == 0 else seq_scr[...]

            # Hoisted input projection: one big MXU matmul, off the serial
            # critical path of the recurrence.
            gx_scr[...] = (jnp.dot(inp, wih_t,
                                   preferred_element_type=jnp.float32)
                           + bias)

            h = jnp.zeros((B, H), jnp.float32)
            c = jnp.zeros((B, H), jnp.float32)
            is_last = layer == num_layers - 1

            for t in range(T):  # static, fully unrolled recurrence
                gates = gx_scr[t * B:(t + 1) * B, :] + jnp.dot(
                    h, whh_t, preferred_element_type=jnp.float32)
                # Gate math stays in f32 (VPU/EUP), PyTorch gate order i,f,g,o.
                i_g = jax.nn.sigmoid(gates[:, 0 * H:1 * H])
                f_g = jax.nn.sigmoid(gates[:, 1 * H:2 * H])
                g_g = jnp.tanh(gates[:, 2 * H:3 * H])
                o_g = jax.nn.sigmoid(gates[:, 3 * H:4 * H])
                c = f_g * c + i_g * g_g
                h = o_g * jnp.tanh(c)
                if not is_last:
                    # Only non-final layers need the full hidden sequence.
                    seq_scr[t * B:(t + 1) * B, :] = h

        # Fused FC head on the final hidden state of the last layer.
        out_ref[...] = (jnp.dot(h, fc_wt_ref[...],
                                preferred_element_type=jnp.float32)
                        + fc_b_ref[...])

    return kernel


# -------------------------------- Wrapper ------------------------------------

def lstm_fused_call(x_flat, layer_params, fc_wt, fc_b, *, T, B):
    """x_flat: (T*B, input_dim) time-major-flattened -> (B, output_dim)."""
    H = layer_params[0][1].shape[0]
    O = fc_wt.shape[1]
    num_layers = len(layer_params)

    flat_w = []
    in_specs = [pl.BlockSpec(x_flat.shape, lambda: (0, 0))]
    for wih_t, whh_t, bias in layer_params:
        flat_w += [wih_t, whh_t, bias]
        in_specs += [
            pl.BlockSpec(wih_t.shape, lambda: (0, 0)),
            pl.BlockSpec(whh_t.shape, lambda: (0, 0)),
            pl.BlockSpec(bias.shape, lambda: (0, 0)),
        ]
    in_specs += [
        pl.BlockSpec(fc_wt.shape, lambda: (0, 0)),
        pl.BlockSpec(fc_b.shape, lambda: (0, 0)),
    ]

    kernel = _make_fused_lstm_kernel(num_layers, T, B, H)
    return pl.pallas_call(
        kernel,
        out_shape=jax.ShapeDtypeStruct((B, O), jnp.float32),
        in_specs=in_specs,
        out_specs=pl.BlockSpec((B, O), lambda: (0, 0)),
        scratch_shapes=[
            pltpu.VMEM((T * B, 4 * H), jnp.float32),   # hoisted input gates
            pltpu.VMEM((T * B, H), jnp.float32),       # inter-layer hidden seq
        ],
    )(x_flat, *flat_w, fc_wt, fc_b)


@jax.jit
def lstm_forward(x, layer_params, fc_wt, fc_b):
    """x: (B, T, input_dim) batch_first -> (B, output_dim)."""
    B, T, Din = x.shape
    # Time-major flatten so the input projection is one big matmul in-kernel.
    x_flat = jnp.transpose(x, (1, 0, 2)).reshape(T * B, Din)
    return lstm_fused_call(x_flat, layer_params, fc_wt, fc_b, T=T, B=B)


# --------------------------- Parameter creation ------------------------------

def init_params(key, input_dim, hidden_dim, output_dim, num_layers):
    layer_params = []
    for l in range(num_layers):
        d_in = input_dim if l == 0 else hidden_dim
        key, k1, k2, k3, k4 = jax.random.split(key, 5)
        scale = 1.0 / jnp.sqrt(hidden_dim)
        w_ih = jax.random.uniform(k1, (4 * hidden_dim, d_in), jnp.float32,
                                  -scale, scale)
        w_hh = jax.random.uniform(k2, (4 * hidden_dim, hidden_dim), jnp.float32,
                                  -scale, scale)
        b_ih = jax.random.uniform(k3, (4 * hidden_dim,), jnp.float32,
                                  -scale, scale)
        b_hh = jax.random.uniform(k4, (4 * hidden_dim,), jnp.float32,
                                  -scale, scale)
        layer_params.append((w_ih.T, w_hh.T, (b_ih + b_hh)[None, :]))
    key, k5, k6 = jax.random.split(key, 3)
    scale = 1.0 / jnp.sqrt(hidden_dim)
    fc_w = jax.random.uniform(k5, (output_dim, hidden_dim), jnp.float32,
                              -scale, scale)
    fc_b = jax.random.uniform(k6, (output_dim,), jnp.float32, -scale, scale)
    return tuple(layer_params), fc_w.T, fc_b[None, :]


# ------------------------------ Reference (jnp) ------------------------------

def reference_forward(x, layer_params, fc_wt, fc_b):
    B, T, _ = x.shape
    seq = jnp.transpose(x, (1, 0, 2))
    for wih_t, whh_t, b in layer_params:
        H = whh_t.shape[0]
        h = jnp.zeros((B, H), jnp.float32)
        c = jnp.zeros((B, H), jnp.float32)
        outs = []
        for t in range(T):
            gates = seq[t] @ wih_t + h @ whh_t + b
            i_g = jax.nn.sigmoid(gates[:, 0 * H:1 * H])
            f_g = jax.nn.sigmoid(gates[:, 1 * H:2 * H])
            g_g = jnp.tanh(gates[:, 2 * H:3 * H])
            o_g = jax.nn.sigmoid(gates[:, 3 * H:4 * H])
            c = f_g * c + i_g * g_g
            h = o_g * jnp.tanh(c)
            outs.append(h)
        seq = jnp.stack(outs, axis=0)
    return seq[-1] @ fc_wt + fc_b


# ----------------------------------- Main ------------------------------------

if __name__ == "__main__":
    B, T = 2, 8
    input_dim, hidden_dim, output_dim, num_layers = 16, 32, 4, 2
    dropout_rate = 0.1  # inactive at inference

    key = jax.random.PRNGKey(0)
    key, xk = jax.random.split(key)
    x = jax.random.normal(xk, (B, T, input_dim), jnp.float32)

    layer_params, fc_wt, fc_b = init_params(
        key, input_dim, hidden_dim, output_dim, num_layers)

    out = lstm_forward(x, layer_params, fc_wt, fc_b)
    out = jax.block_until_ready(out)

    ref = reference_forward(x, layer_params, fc_wt, fc_b)
    assert out.shape == (B, output_dim)
    assert jnp.allclose(out, ref, atol=1e-4, rtol=1e-4), (out, ref)

    print("KERNEL_OK")
</pallas_src>

<mosaic_0001>
module attributes {stable_mosaic.version = 11 : i64} {
  func.func @kernel(%arg0: memref<16x16xf32, #tpu.memory_space<vmem>>, %arg1: memref<16x128xf32, #tpu.memory_space<vmem>>, %arg2: memref<32x128xf32, #tpu.memory_space<vmem>>, %arg3: memref<1x128xf32, #tpu.memory_space<vmem>>, %arg4: memref<32x128xf32, #tpu.memory_space<vmem>>, %arg5: memref<32x128xf32, #tpu.memory_space<vmem>>, %arg6: memref<1x128xf32, #tpu.memory_space<vmem>>, %arg7: memref<32x4xf32, #tpu.memory_space<vmem>>, %arg8: memref<1x4xf32, #tpu.memory_space<vmem>>, %arg9: memref<2x4xf32, #tpu.memory_space<vmem>>, %arg10: memref<16x128xf32, #tpu.memory_space<vmem>>, %arg11: memref<16x32xf32, #tpu.memory_space<vmem>>) attributes {dimension_semantics = [], scalar_prefetch = 0 : i64, scratch_operands = 2 : i64, tpu.core_type = #tpu.core_type<tc>} {
    %c0 = arith.constant 0 : index
    %c0_0 = arith.constant 0 : index
    %0 = vector.load %arg1[%c0, %c0_0] : memref<16x128xf32, #tpu.memory_space<vmem>>, vector<16x128xf32>
    %c0_1 = arith.constant 0 : index
    %c0_2 = arith.constant 0 : index
    %1 = vector.load %arg2[%c0_1, %c0_2] : memref<32x128xf32, #tpu.memory_space<vmem>>, vector<32x128xf32>
    %c0_3 = arith.constant 0 : index
    %c0_4 = arith.constant 0 : index
    %2 = vector.load %arg3[%c0_3, %c0_4] : memref<1x128xf32, #tpu.memory_space<vmem>>, vector<1x128xf32>
    %c0_5 = arith.constant 0 : index
    %c0_6 = arith.constant 0 : index
    %3 = vector.load %arg0[%c0_5, %c0_6] : memref<16x16xf32, #tpu.memory_space<vmem>>, vector<16x16xf32>
    %cst = arith.constant dense<0.000000e+00> : vector<16x128xf32>
    %4 = tpu.matmul %3, %0, %cst {dimension_numbers = #tpu.dot_dimension_numbers<[1], [0], [0], [1], [0, 0, 1, 1], [], []>} : vector<16x16xf32>, vector<16x128xf32>, vector<16x128xf32> -> vector<16x128xf32>
    %5 = vector.broadcast %2 : vector<1x128xf32> to vector<16x128xf32>
    %6 = arith.addf %4, %5 : vector<16x128xf32>
    %c0_7 = arith.constant 0 : index
    %c0_8 = arith.constant 0 : index
    %7 = vector.load %arg10[%c0_7, %c0_8] : memref<16x128xf32, #tpu.memory_space<vmem>>, vector<16x128xf32>
    tpu.vector_store %arg10[%c0_7, %c0_8], %6 {strides = array<i32>} : memref<16x128xf32, #tpu.memory_space<vmem>>, vector<16x128xf32>,
    %cst_9 = arith.constant 0.000000e+00 : f32
    %8 = vector.broadcast %cst_9 : f32 to vector<2x32xf32>
    %cst_10 = arith.constant 0.000000e+00 : f32
    %9 = vector.broadcast %cst_10 : f32 to vector<2x32xf32>
    %c0_11 = arith.constant 0 : index
    %c0_12 = arith.constant 0 : index
    %10 = vector.load %arg10[%c0_11, %c0_12] : memref<16x128xf32, #tpu.memory_space<vmem>>, vector<2x128xf32>
    %cst_13 = arith.constant dense<0.000000e+00> : vector<2x128xf32>
    %11 = tpu.matmul %8, %1, %cst_13 {dimension_numbers = #tpu.dot_dimension_numbers<[1], [0], [0], [1], [0, 0, 1, 1], [], []>} : vector<2x32xf32>, vector<32x128xf32>, vector<2x128xf32> -> vector<2x128xf32>
    %12 = arith.addf %10, %11 : vector<2x128xf32>
    %13 = vector.extract_strided_slice %12 {offsets = [0, 0], sizes = [2, 32], strides = [1, 1]} : vector<2x128xf32> to vector<2x32xf32>
    %14 = arith.negf %13 : vector<2x32xf32>
    %15 = math.exp %14 : vector<2x32xf32>
    %cst_14 = arith.constant 1.000000e+00 : f32
    %16 = vector.broadcast %cst_14 : f32 to vector<2x32xf32>
    %17 = arith.addf %16, %15 : vector<2x32xf32>
    %18 = arith.divf %16, %17 : vector<2x32xf32>
    %19 = vector.extract_strided_slice %12 {offsets = [0, 32], sizes = [2, 32], strides = [1, 1]} : vector<2x128xf32> to vector<2x32xf32>
    %20 = arith.negf %19 : vector<2x32xf32>
    %21 = math.exp %20 : vector<2x32xf32>
    %cst_15 = arith.constant 1.000000e+00 : f32
    %22 = vector.broadcast %cst_15 : f32 to vector<2x32xf32>
    %23 = arith.addf %22, %21 : vector<2x32xf32>
    %24 = arith.divf %22, %23 : vector<2x32xf32>
    %25 = vector.extract_strided_slice %12 {offsets = [0, 64], sizes = [2, 32], strides = [1, 1]} : vector<2x128xf32> to vector<2x32xf32>
    %26 = math.tanh %25 : vector<2x32xf32>
    %27 = vector.extract_strided_slice %12 {offsets = [0, 96], sizes = [2, 32], strides = [1, 1]} : vector<2x128xf32> to vector<2x32xf32>
    %28 = arith.negf %27 : vector<2x32xf32>
    %29 = math.exp %28 : vector<2x32xf32>
    %cst_16 = arith.constant 1.000000e+00 : f32
    %30 = vector.broadcast %cst_16 : f32 to vector<2x32xf32>
    %31 = arith.addf %30, %29 : vector<2x32xf32>
    %32 = arith.divf %30, %31 : vector<2x32xf32>
    %33 = arith.mulf %24, %9 : vector<2x32xf32>
    %34 = arith.mulf %18, %26 : vector<2x32xf32>
    %35 = arith.addf %33, %34 : vector<2x32xf32>
    %36 = math.tanh %35 : vector<2x32xf32>
    %37 = arith.mulf %32, %36 : vector<2x32xf32>
    %c0_17 = arith.constant 0 : index
    %c0_18 = arith.constant 0 : index
    %38 = vector.load %arg11[%c0_17, %c0_18] : memref<16x32xf32, #tpu.memory_space<vmem>>, vector<2x32xf32>
    tpu.vector_store %arg11[%c0_17, %c0_18], %37 {strides = array<i32>} : memref<16x32xf32, #tpu.memory_space<vmem>>, vector<2x32xf32>,
    %c2 = arith.constant 2 : index
    %c0_19 = arith.constant 0 : index
    %39 = vector.load %arg10[%c2, %c0_19] : memref<16x128xf32, #tpu.memory_space<vmem>>, vector<2x128xf32>
    %cst_20 = arith.constant dense<0.000000e+00> : vector<2x128xf32>
    %40 = tpu.matmul %37, %1, %cst_20 {dimension_numbers = #tpu.dot_dimension_numbers<[1], [0], [0], [1], [0, 0, 1, 1], [], []>} : vector<2x32xf32>, vector<32x128xf32>, vector<2x128xf32> -> vector<2x128xf32>
    %41 = arith.addf %39, %40 : vector<2x128xf32>
    %42 = vector.extract_strided_slice %41 {offsets = [0, 0], sizes = [2, 32], strides = [1, 1]} : vector<2x128xf32> to vector<2x32xf32>
    %43 = arith.negf %42 : vector<2x32xf32>
    %44 = math.exp %43 : vector<2x32xf32>
    %cst_21 = arith.constant 1.000000e+00 : f32
    %45 = vector.broadcast %cst_21 : f32 to vector<2x32xf32>
    %46 = arith.addf %45, %44 : vector<2x32xf32>
    %47 = arith.divf %45, %46 : vector<2x32xf32>
    %48 = vector.extract_strided_slice %41 {offsets = [0, 32], sizes = [2, 32], strides = [1, 1]} : vector<2x128xf32> to vector<2x32xf32>
    %49 = arith.negf %48 : vector<2x32xf32>
    %50 = math.exp %49 : vector<2x32xf32>
    %cst_22 = arith.constant 1.000000e+00 : f32
    %51 = vector.broadcast %cst_22 : f32 to vector<2x32xf32>
    %52 = arith.addf %51, %50 : vector<2x32xf32>
    %53 = arith.divf %51, %52 : vector<2x32xf32>
    %54 = vector.extract_strided_slice %41 {offsets = [0, 64], sizes = [2, 32], strides = [1, 1]} : vector<2x128xf32> to vector<2x32xf32>
    %55 = math.tanh %54 : vector<2x32xf32>
    %56 = vector.extract_strided_slice %41 {offsets = [0, 96], sizes = [2, 32], strides = [1, 1]} : vector<2x128xf32> to vector<2x32xf32>
    %57 = arith.negf %56 : vector<2x32xf32>
    %58 = math.exp %57 : vector<2x32xf32>
    %cst_23 = arith.constant 1.000000e+00 : f32
    %59 = vector.broadcast %cst_23 : f32 to vector<2x32xf32>
    %60 = arith.addf %59, %58 : vector<2x32xf32>
    %61 = arith.divf %59, %60 : vector<2x32xf32>
    %62 = arith.mulf %53, %35 : vector<2x32xf32>
    %63 = arith.mulf %47, %55 : vector<2x32xf32>
    %64 = arith.addf %62, %63 : vector<2x32xf32>
    %65 = math.tanh %64 : vector<2x32xf32>
    %66 = arith.mulf %61, %65 : vector<2x32xf32>
    %c2_24 = arith.constant 2 : index
    %c0_25 = arith.constant 0 : index
    %67 = vector.load %arg11[%c2_24, %c0_25] : memref<16x32xf32, #tpu.memory_space<vmem>>, vector<2x32xf32>
    tpu.vector_store %arg11[%c2_24, %c0_25], %66 {strides = array<i32>} : memref<16x32xf32, #tpu.memory_space<vmem>>, vector<2x32xf32>,
    %c4 = arith.constant 4 : index
    %c0_26 = arith.constant 0 : index
    %68 = vector.load %arg10[%c4, %c0_26] : memref<16x128xf32, #tpu.memory_space<vmem>>, vector<2x128xf32>
    %cst_27 = arith.constant dense<0.000000e+00> : vector<2x128xf32>
    %69 = tpu.matmul %66, %1, %cst_27 {dimension_numbers = #tpu.dot_dimension_numbers<[1], [0], [0], [1], [0, 0, 1, 1], [], []>} : vector<2x32xf32>, vector<32x128xf32>, vector<2x128xf32> -> vector<2x128xf32>
    %70 = arith.addf %68, %69 : vector<2x128xf32>
    %71 = vector.extract_strided_slice %70 {offsets = [0, 0], sizes = [2, 32], strides = [1, 1]} : vector<2x128xf32> to vector<2x32xf32>
    %72 = arith.negf %71 : vector<2x32xf32>
    %73 = math.exp %72 : vector<2x32xf32>
    %cst_28 = arith.constant 1.000000e+00 : f32
    %74 = vector.broadcast %cst_28 : f32 to vector<2x32xf32>
    %75 = arith.addf %74, %73 : vector<2x32xf32>
    %76 = arith.divf %74, %75 : vector<2x32xf32>
    %77 = vector.extract_strided_slice %70 {offsets = [0, 32], sizes = [2, 32], strides = [1, 1]} : vector<2x128xf32> to vector<2x32xf32>
    %78 = arith.negf %77 : vector<2x32xf32>
    %79 = math.exp %78 : vector<2x32xf32>
    %cst_29 = arith.constant 1.000000e+00 : f32
    %80 = vector.broadcast %cst_29 : f32 to vector<2x32xf32>
    %81 = arith.addf %80, %79 : vector<2x32xf32>
    %82 = arith.divf %80, %81 : vector<2x32xf32>
    %83 = vector.extract_strided_slice %70 {offsets = [0, 64], sizes = [2, 32], strides = [1, 1]} : vector<2x128xf32> to vector<2x32xf32>
    %84 = math.tanh %83 : vector<2x32xf32>
    %85 = vector.extract_strided_slice %70 {offsets = [0, 96], sizes = [2, 32], strides = [1, 1]} : vector<2x128xf32> to vector<2x32xf32>
    %86 = arith.negf %85 : vector<2x32xf32>
    %87 = math.exp %86 : vector<2x32xf32>
    %cst_30 = arith.constant 1.000000e+00 : f32
    %88 = vector.broadcast %cst_30 : f32 to vector<2x32xf32>
    %89 = arith.addf %88, %87 : vector<2x32xf32>
    %90 = arith.divf %88, %89 : vector<2x32xf32>
    %91 = arith.mulf %82, %64 : vector<2x32xf32>
    %92 = arith.mulf %76, %84 : vector<2x32xf32>
    %93 = arith.addf %91, %92 : vector<2x32xf32>
    %94 = math.tanh %93 : vector<2x32xf32>
    %95 = arith.mulf %90, %94 : vector<2x32xf32>
    %c4_31 = arith.constant 4 : index
    %c0_32 = arith.constant 0 : index
    %96 = vector.load %arg11[%c4_31, %c0_32] : memref<16x32xf32, #tpu.memory_space<vmem>>, vector<2x32xf32>
    tpu.vector_store %arg11[%c4_31, %c0_32], %95 {strides = array<i32>} : memref<16x32xf32, #tpu.memory_space<vmem>>, vector<2x32xf32>,
    %c6 = arith.constant 6 : index
    %c0_33 = arith.constant 0 : index
    %97 = vector.load %arg10[%c6, %c0_33] : memref<16x128xf32, #tpu.memory_space<vmem>>, vector<2x128xf32>
    %cst_34 = arith.constant dense<0.000000e+00> : vector<2x128xf32>
    %98 = tpu.matmul %95, %1, %cst_34 {dimension_numbers = #tpu.dot_dimension_numbers<[1], [0], [0], [1], [0, 0, 1, 1], [], []>} : vector<2x32xf32>, vector<32x128xf32>, vector<2x128xf32> -> vector<2x128xf32>
    %99 = arith.addf %97, %98 : vector<2x128xf32>
    %100 = vector.extract_strided_slice %99 {offsets = [0, 0], sizes = [2, 32], strides = [1, 1]} : vector<2x128xf32> to vector<2x32xf32>
    %101 = arith.negf %100 : vector<2x32xf32>
    %102 = math.exp %101 : vector<2x32xf32>
    %cst_35 = arith.constant 1.000000e+00 : f32
    %103 = vector.broadcast %cst_35 : f32 to vector<2x32xf32>
    %104 = arith.addf %103, %102 : vector<2x32xf32>
    %105 = arith.divf %103, %104 : vector<2x32xf32>
    %106 = vector.extract_strided_slice %99 {offsets = [0, 32], sizes = [2, 32], strides = [1, 1]} : vector<2x128xf32> to vector<2x32xf32>
    %107 = arith.negf %106 : vector<2x32xf32>
    %108 = math.exp %107 : vector<2x32xf32>
    %cst_36 = arith.constant 1.000000e+00 : f32
    %109 = vector.broadcast %cst_36 : f32 to vector<2x32xf32>
    %110 = arith.addf %109, %108 : vector<2x32xf32>
    %111 = arith.divf %109, %110 : vector<2x32xf32>
    %112 = vector.extract_strided_slice %99 {offsets = [0, 64], sizes = [2, 32], strides = [1, 1]} : vector<2x128xf32> to vector<2x32xf32>
    %113 = math.tanh %112 : vector<2x32xf32>
    %114 = vector.extract_strided_slice %99 {offsets = [0, 96], sizes = [2, 32], strides = [1, 1]} : vector<2x128xf32> to vector<2x32xf32>
    %115 = arith.negf %114 : vector<2x32xf32>
    %116 = math.exp %115 : vector<2x32xf32>
    %cst_37 = arith.constant 1.000000e+00 : f32
    %117 = vector.broadcast %cst_37 : f32 to vector<2x32xf32>
    %118 = arith.addf %117, %116 : vector<2x32xf32>
    %119 = arith.divf %117, %118 : vector<2x32xf32>
    %120 = arith.mulf %111, %93 : vector<2x32xf32>
    %121 = arith.mulf %105, %113 : vector<2x32xf32>
    %122 = arith.addf %120, %121 : vector<2x32xf32>
    %123 = math.tanh %122 : vector<2x32xf32>
    %124 = arith.mulf %119, %123 : vector<2x32xf32>
    %c6_38 = arith.constant 6 : index
    %c0_39 = arith.constant 0 : index
    %125 = vector.load %arg11[%c6_38, %c0_39] : memref<16x32xf32, #tpu.memory_space<vmem>>, vector<2x32xf32>
    tpu.vector_store %arg11[%c6_38, %c0_39], %124 {strides = array<i32>} : memref<16x32xf32, #tpu.memory_space<vmem>>, vector<2x32xf32>,
    %c8 = arith.constant 8 : index
    %c0_40 = arith.constant 0 : index
    %126 = vector.load %arg10[%c8, %c0_40] : memref<16x128xf32, #tpu.memory_space<vmem>>, vector<2x128xf32>
    %cst_41 = arith.constant dense<0.000000e+00> : vector<2x128xf32>
    %127 = tpu.matmul %124, %1, %cst_41 {dimension_numbers = #tpu.dot_dimension_numbers<[1], [0], [0], [1], [0, 0, 1, 1], [], []>} : vector<2x32xf32>, vector<32x128xf32>, vector<2x128xf32> -> vector<2x128xf32>
    %128 = arith.addf %126, %127 : vector<2x128xf32>
    %129 = vector.extract_strided_slice %128 {offsets = [0, 0], sizes = [2, 32], strides = [1, 1]} : vector<2x128xf32> to vector<2x32xf32>
    %130 = arith.negf %129 : vector<2x32xf32>
    %131 = math.exp %130 : vector<2x32xf32>
    %cst_42 = arith.constant 1.000000e+00 : f32
    %132 = vector.broadcast %cst_42 : f32 to vector<2x32xf32>
    %133 = arith.addf %132, %131 : vector<2x32xf32>
    %134 = arith.divf %132, %133 : vector<2x32xf32>
    %135 = vector.extract_strided_slice %128 {offsets = [0, 32], sizes = [2, 32], strides = [1, 1]} : vector<2x128xf32> to vector<2x32xf32>
    %136 = arith.negf %135 : vector<2x32xf32>
    %137 = math.exp %136 : vector<2x32xf32>
    %cst_43 = arith.constant 1.000000e+00 : f32
    %138 = vector.broadcast %cst_43 : f32 to vector<2x32xf32>
    %139 = arith.addf %138, %137 : vector<2x32xf32>
    %140 = arith.divf %138, %139 : vector<2x32xf32>
    %141 = vector.extract_strided_slice %128 {offsets = [0, 64], sizes = [2, 32], strides = [1, 1]} : vector<2x128xf32> to vector<2x32xf32>
    %142 = math.tanh %141 : vector<2x32xf32>
    %143 = vector.extract_strided_slice %128 {offsets = [0, 96], sizes = [2, 32], strides = [1, 1]} : vector<2x128xf32> to vector<2x32xf32>
    %144 = arith.negf %143 : vector<2x32xf32>
    %145 = math.exp %144 : vector<2x32xf32>
    %cst_44 = arith.constant 1.000000e+00 : f32
    %146 = vector.broadcast %cst_44 : f32 to vector<2x32xf32>
    %147 = arith.addf %146, %145 : vector<2x32xf32>
    %148 = arith.divf %146, %147 : vector<2x32xf32>
    %149 = arith.mulf %140, %122 : vector<2x32xf32>
    %150 = arith.mulf %134, %142 : vector<2x32xf32>
    %151 = arith.addf %149, %150 : vector<2x32xf32>
    %152 = math.tanh %151 : vector<2x32xf32>
    %153 = arith.mulf %148, %152 : vector<2x32xf32>
    %c8_45 = arith.constant 8 : index
    %c0_46 = arith.constant 0 : index
    %154 = vector.load %arg11[%c8_45, %c0_46] : memref<16x32xf32, #tpu.memory_space<vmem>>, vector<2x32xf32>
    tpu.vector_store %arg11[%c8_45, %c0_46], %153 {strides = array<i32>} : memref<16x32xf32, #tpu.memory_space<vmem>>, vector<2x32xf32>,
    %c10 = arith.constant 10 : index
    %c0_47 = arith.constant 0 : index
    %155 = vector.load %arg10[%c10, %c0_47] : memref<16x128xf32, #tpu.memory_space<vmem>>, vector<2x128xf32>
    %cst_48 = arith.constant dense<0.000000e+00> : vector<2x128xf32>
    %156 = tpu.matmul %153, %1, %cst_48 {dimension_numbers = #tpu.dot_dimension_numbers<[1], [0], [0], [1], [0, 0, 1, 1], [], []>} : vector<2x32xf32>, vector<32x128xf32>, vector<2x128xf32> -> vector<2x128xf32>
    %157 = arith.addf %155, %156 : vector<2x128xf32>
    %158 = vector.extract_strided_slice %157 {offsets = [0, 0], sizes = [2, 32], strides = [1, 1]} : vector<2x128xf32> to vector<2x32xf32>
    %159 = arith.negf %158 : vector<2x32xf32>
    %160 = math.exp %159 : vector<2x32xf32>
    %cst_49 = arith.constant 1.000000e+00 : f32
    %161 = vector.broadcast %cst_49 : f32 to vector<2x32xf32>
    %162 = arith.addf %161, %160 : vector<2x32xf32>
    %163 = arith.divf %161, %162 : vector<2x32xf32>
    %164 = vector.extract_strided_slice %157 {offsets = [0, 32], sizes = [2, 32], strides = [1, 1]} : vector<2x128xf32> to vector<2x32xf32>
    %165 = arith.negf %164 : vector<2x32xf32>
    %166 = math.exp %165 : vector<2x32xf32>
    %cst_50 = arith.constant 1.000000e+00 : f32
    %167 = vector.broadcast %cst_50 : f32 to vector<2x32xf32>
    %168 = arith.addf %167, %166 : vector<2x32xf32>
    %169 = arith.divf %167, %168 : vector<2x32xf32>
    %170 = vector.extract_strided_slice %157 {offsets = [0, 64], sizes = [2, 32], strides = [1, 1]} : vector<2x128xf32> to vector<2x32xf32>
    %171 = math.tanh %170 : vector<2x32xf32>
    %172 = vector.extract_strided_slice %157 {offsets = [0, 96], sizes = [2, 32], strides = [1, 1]} : vector<2x128xf32> to vector<2x32xf32>
    %173 = arith.negf %172 : vector<2x32xf32>
    %174 = math.exp %173 : vector<2x32xf32>
    %cst_51 = arith.constant 1.000000e+00 : f32
    %175 = vector.broadcast %cst_51 : f32 to vector<2x32xf32>
    %176 = arith.addf %175, %174 : vector<2x32xf32>
    %177 = arith.divf %175, %176 : vector<2x32xf32>
    %178 = arith.mulf %169, %151 : vector<2x32xf32>
    %179 = arith.mulf %163, %171 : vector<2x32xf32>
    %180 = arith.addf %178, %179 : vector<2x32xf32>
    %181 = math.tanh %180 : vector<2x32xf32>
    %182 = arith.mulf %177, %181 : vector<2x32xf32>
    %c10_52 = arith.constant 10 : index
    %c0_53 = arith.constant 0 : index
    %183 = vector.load %arg11[%c10_52, %c0_53] : memref<16x32xf32, #tpu.memory_space<vmem>>, vector<2x32xf32>
    tpu.vector_store %arg11[%c10_52, %c0_53], %182 {strides = array<i32>} : memref<16x32xf32, #tpu.memory_space<vmem>>, vector<2x32xf32>,
    %c12 = arith.constant 12 : index
    %c0_54 = arith.constant 0 : index
    %184 = vector.load %arg10[%c12, %c0_54] : memref<16x128xf32, #tpu.memory_space<vmem>>, vector<2x128xf32>
    %cst_55 = arith.constant dense<0.000000e+00> : vector<2x128xf32>
    %185 = tpu.matmul %182, %1, %cst_55 {dimension_numbers = #tpu.dot_dimension_numbers<[1], [0], [0], [1], [0, 0, 1, 1], [], []>} : vector<2x32xf32>, vector<32x128xf32>, vector<2x128xf32> -> vector<2x128xf32>
    %186 = arith.addf %184, %185 : vector<2x128xf32>
    %187 = vector.extract_strided_slice %186 {offsets = [0, 0], sizes = [2, 32], strides = [1, 1]} : vector<2x128xf32> to vector<2x32xf32>
    %188 = arith.negf %187 : vector<2x32xf32>
    %189 = math.exp %188 : vector<2x32xf32>
    %cst_56 = arith.constant 1.000000e+00 : f32
    %190 = vector.broadcast %cst_56 : f32 to vector<2x32xf32>
    %191 = arith.addf %190, %189 : vector<2x32xf32>
    %192 = arith.divf %190, %191 : vector<2x32xf32>
    %193 = vector.extract_strided_slice %186 {offsets = [0, 32], sizes = [2, 32], strides = [1, 1]} : vector<2x128xf32> to vector<2x32xf32>
    %194 = arith.negf %193 : vector<2x32xf32>
    %195 = math.exp %194 : vector<2x32xf32>
    %cst_57 = arith.constant 1.000000e+00 : f32
    %196 = vector.broadcast %cst_57 : f32 to vector<2x32xf32>
    %197 = arith.addf %196, %195 : vector<2x32xf32>
    %198 = arith.divf %196, %197 : vector<2x32xf32>
    %199 = vector.extract_strided_slice %186 {offsets = [0, 64], sizes = [2, 32], strides = [1, 1]} : vector<2x128xf32> to vector<2x32xf32>
    %200 = math.tanh %199 : vector<2x32xf32>
    %201 = vector.extract_strided_slice %186 {offsets = [0, 96], sizes = [2, 32], strides = [1, 1]} : vector<2x128xf32> to vector<2x32xf32>
    %202 = arith.negf %201 : vector<2x32xf32>
    %203 = math.exp %202 : vector<2x32xf32>
    %cst_58 = arith.constant 1.000000e+00 : f32
    %204 = vector.broadcast %cst_58 : f32 to vector<2x32xf32>
    %205 = arith.addf %204, %203 : vector<2x32xf32>
    %206 = arith.divf %204, %205 : vector<2x32xf32>
    %207 = arith.mulf %198, %180 : vector<2x32xf32>
    %208 = arith.mulf %192, %200 : vector<2x32xf32>
    %209 = arith.addf %207, %208 : vector<2x32xf32>
    %210 = math.tanh %209 : vector<2x32xf32>
    %211 = arith.mulf %206, %210 : vector<2x32xf32>
    %c12_59 = arith.constant 12 : index
    %c0_60 = arith.constant 0 : index
    %212 = vector.load %arg11[%c12_59, %c0_60] : memref<16x32xf32, #tpu.memory_space<vmem>>, vector<2x32xf32>
    tpu.vector_store %arg11[%c12_59, %c0_60], %211 {strides = array<i32>} : memref<16x32xf32, #tpu.memory_space<vmem>>, vector<2x32xf32>,
    %c14 = arith.constant 14 : index
    %c0_61 = arith.constant 0 : index
    %213 = vector.load %arg10[%c14, %c0_61] : memref<16x128xf32, #tpu.memory_space<vmem>>, vector<2x128xf32>
    %cst_62 = arith.constant dense<0.000000e+00> : vector<2x128xf32>
    %214 = tpu.matmul %211, %1, %cst_62 {dimension_numbers = #tpu.dot_dimension_numbers<[1], [0], [0], [1], [0, 0, 1, 1], [], []>} : vector<2x32xf32>, vector<32x128xf32>, vector<2x128xf32> -> vector<2x128xf32>
    %215 = arith.addf %213, %214 : vector<2x128xf32>
    %216 = vector.extract_strided_slice %215 {offsets = [0, 0], sizes = [2, 32], strides = [1, 1]} : vector<2x128xf32> to vector<2x32xf32>
    %217 = arith.negf %216 : vector<2x32xf32>
    %218 = math.exp %217 : vector<2x32xf32>
    %cst_63 = arith.constant 1.000000e+00 : f32
    %219 = vector.broadcast %cst_63 : f32 to vector<2x32xf32>
    %220 = arith.addf %219, %218 : vector<2x32xf32>
    %221 = arith.divf %219, %220 : vector<2x32xf32>
    %222 = vector.extract_strided_slice %215 {offsets = [0, 32], sizes = [2, 32], strides = [1, 1]} : vector<2x128xf32> to vector<2x32xf32>
    %223 = arith.negf %222 : vector<2x32xf32>
    %224 = math.exp %223 : vector<2x32xf32>
    %cst_64 = arith.constant 1.000000e+00 : f32
    %225 = vector.broadcast %cst_64 : f32 to vector<2x32xf32>
    %226 = arith.addf %225, %224 : vector<2x32xf32>
    %227 = arith.divf %225, %226 : vector<2x32xf32>
    %228 = vector.extract_strided_slice %215 {offsets = [0, 64], sizes = [2, 32], strides = [1, 1]} : vector<2x128xf32> to vector<2x32xf32>
    %229 = math.tanh %228 : vector<2x32xf32>
    %230 = vector.extract_strided_slice %215 {offsets = [0, 96], sizes = [2, 32], strides = [1, 1]} : vector<2x128xf32> to vector<2x32xf32>
    %231 = arith.negf %230 : vector<2x32xf32>
    %232 = math.exp %231 : vector<2x32xf32>
    %cst_65 = arith.constant 1.000000e+00 : f32
    %233 = vector.broadcast %cst_65 : f32 to vector<2x32xf32>
    %234 = arith.addf %233, %232 : vector<2x32xf32>
    %235 = arith.divf %233, %234 : vector<2x32xf32>
    %236 = arith.mulf %227, %209 : vector<2x32xf32>
    %237 = arith.mulf %221, %229 : vector<2x32xf32>
    %238 = arith.addf %236, %237 : vector<2x32xf32>
    %239 = math.tanh %238 : vector<2x32xf32>
    %240 = arith.mulf %235, %239 : vector<2x32xf32>
    %c14_66 = arith.constant 14 : index
    %c0_67 = arith.constant 0 : index
    %241 = vector.load %arg11[%c14_66, %c0_67] : memref<16x32xf32, #tpu.memory_space<vmem>>, vector<2x32xf32>
    tpu.vector_store %arg11[%c14_66, %c0_67], %240 {strides = array<i32>} : memref<16x32xf32, #tpu.memory_space<vmem>>, vector<2x32xf32>,
    %c0_68 = arith.constant 0 : index
    %c0_69 = arith.constant 0 : index
    %242 = vector.load %arg4[%c0_68, %c0_69] : memref<32x128xf32, #tpu.memory_space<vmem>>, vector<32x128xf32>
    %c0_70 = arith.constant 0 : index
    %c0_71 = arith.constant 0 : index
    %243 = vector.load %arg5[%c0_70, %c0_71] : memref<32x128xf32, #tpu.memory_space<vmem>>, vector<32x128xf32>
    %c0_72 = arith.constant 0 : index
    %c0_73 = arith.constant 0 : index
    %244 = vector.load %arg6[%c0_72, %c0_73] : memref<1x128xf32, #tpu.memory_space<vmem>>, vector<1x128xf32>
    %c0_74 = arith.constant 0 : index
    %c0_75 = arith.constant 0 : index
    %245 = vector.load %arg11[%c0_74, %c0_75] : memref<16x32xf32, #tpu.memory_space<vmem>>, vector<16x32xf32>
    %cst_76 = arith.constant dense<0.000000e+00> : vector<16x128xf32>
    %246 = tpu.matmul %245, %242, %cst_76 {dimension_numbers = #tpu.dot_dimension_numbers<[1], [0], [0], [1], [0, 0, 1, 1], [], []>} : vector<16x32xf32>, vector<32x128xf32>, vector<16x128xf32> -> vector<16x128xf32>
    %247 = vector.broadcast %244 : vector<1x128xf32> to vector<16x128xf32>
    %248 = arith.addf %246, %247 : vector<16x128xf32>
    %c0_77 = arith.constant 0 : index
    %c0_78 = arith.constant 0 : index
    %249 = vector.load %arg10[%c0_77, %c0_78] : memref<16x128xf32, #tpu.memory_space<vmem>>, vector<16x128xf32>
    tpu.vector_store %arg10[%c0_77, %c0_78], %248 {strides = array<i32>} : memref<16x128xf32, #tpu.memory_space<vmem>>, vector<16x128xf32>,
    %cst_79 = arith.constant 0.000000e+00 : f32
    %250 = vector.broadcast %cst_79 : f32 to vector<2x32xf32>
    %cst_80 = arith.constant 0.000000e+00 : f32
    %251 = vector.broadcast %cst_80 : f32 to vector<2x32xf32>
    %c0_81 = arith.constant 0 : index
    %c0_82 = arith.constant 0 : index
    %252 = vector.load %arg10[%c0_81, %c0_82] : memref<16x128xf32, #tpu.memory_space<vmem>>, vector<2x128xf32>
    %cst_83 = arith.constant dense<0.000000e+00> : vector<2x128xf32>
    %253 = tpu.matmul %250, %243, %cst_83 {dimension_numbers = #tpu.dot_dimension_numbers<[1], [0], [0], [1], [0, 0, 1, 1], [], []>} : vector<2x32xf32>, vector<32x128xf32>, vector<2x128xf32> -> vector<2x128xf32>
    %254 = arith.addf %252, %253 : vector<2x128xf32>
    %255 = vector.extract_strided_slice %254 {offsets = [0, 0], sizes = [2, 32], strides = [1, 1]} : vector<2x128xf32> to vector<2x32xf32>
    %256 = arith.negf %255 : vector<2x32xf32>
    %257 = math.exp %256 : vector<2x32xf32>
    %cst_84 = arith.constant 1.000000e+00 : f32
    %258 = vector.broadcast %cst_84 : f32 to vector<2x32xf32>
    %259 = arith.addf %258, %257 : vector<2x32xf32>
    %260 = arith.divf %258, %259 : vector<2x32xf32>
    %261 = vector.extract_strided_slice %254 {offsets = [0, 32], sizes = [2, 32], strides = [1, 1]} : vector<2x128xf32> to vector<2x32xf32>
    %262 = arith.negf %261 : vector<2x32xf32>
    %263 = math.exp %262 : vector<2x32xf32>
    %cst_85 = arith.constant 1.000000e+00 : f32
    %264 = vector.broadcast %cst_85 : f32 to vector<2x32xf32>
    %265 = arith.addf %264, %263 : vector<2x32xf32>
    %266 = arith.divf %264, %265 : vector<2x32xf32>
    %267 = vector.extract_strided_slice %254 {offsets = [0, 64], sizes = [2, 32], strides = [1, 1]} : vector<2x128xf32> to vector<2x32xf32>
    %268 = math.tanh %267 : vector<2x32xf32>
    %269 = vector.extract_strided_slice %254 {offsets = [0, 96], sizes = [2, 32], strides = [1, 1]} : vector<2x128xf32> to vector<2x32xf32>
    %270 = arith.negf %269 : vector<2x32xf32>
    %271 = math.exp %270 : vector<2x32xf32>
    %cst_86 = arith.constant 1.000000e+00 : f32
    %272 = vector.broadcast %cst_86 : f32 to vector<2x32xf32>
    %273 = arith.addf %272, %271 : vector<2x32xf32>
    %274 = arith.divf %272, %273 : vector<2x32xf32>
    %275 = arith.mulf %266, %251 : vector<2x32xf32>
    %276 = arith.mulf %260, %268 : vector<2x32xf32>
    %277 = arith.addf %275, %276 : vector<2x32xf32>
    %278 = math.tanh %277 : vector<2x32xf32>
    %279 = arith.mulf %274, %278 : vector<2x32xf32>
    %c2_87 = arith.constant 2 : index
    %c0_88 = arith.constant 0 : index
    %280 = vector.load %arg10[%c2_87, %c0_88] : memref<16x128xf32, #tpu.memory_space<vmem>>, vector<2x128xf32>
    %cst_89 = arith.constant dense<0.000000e+00> : vector<2x128xf32>
    %281 = tpu.matmul %279, %243, %cst_89 {dimension_numbers = #tpu.dot_dimension_numbers<[1], [0], [0], [1], [0, 0, 1, 1], [], []>} : vector<2x32xf32>, vector<32x128xf32>, vector<2x128xf32> -> vector<2x128xf32>
    %282 = arith.addf %280, %281 : vector<2x128xf32>
    %283 = vector.extract_strided_slice %282 {offsets = [0, 0], sizes = [2, 32], strides = [1, 1]} : vector<2x128xf32> to vector<2x32xf32>
    %284 = arith.negf %283 : vector<2x32xf32>
    %285 = math.exp %284 : vector<2x32xf32>
    %cst_90 = arith.constant 1.000000e+00 : f32
    %286 = vector.broadcast %cst_90 : f32 to vector<2x32xf32>
    %287 = arith.addf %286, %285 : vector<2x32xf32>
    %288 = arith.divf %286, %287 : vector<2x32xf32>
    %289 = vector.extract_strided_slice %282 {offsets = [0, 32], sizes = [2, 32], strides = [1, 1]} : vector<2x128xf32> to vector<2x32xf32>
    %290 = arith.negf %289 : vector<2x32xf32>
    %291 = math.exp %290 : vector<2x32xf32>
    %cst_91 = arith.constant 1.000000e+00 : f32
    %292 = vector.broadcast %cst_91 : f32 to vector<2x32xf32>
    %293 = arith.addf %292, %291 : vector<2x32xf32>
    %294 = arith.divf %292, %293 : vector<2x32xf32>
    %295 = vector.extract_strided_slice %282 {offsets = [0, 64], sizes = [2, 32], strides = [1, 1]} : vector<2x128xf32> to vector<2x32xf32>
    %296 = math.tanh %295 : vector<2x32xf32>
    %297 = vector.extract_strided_slice %282 {offsets = [0, 96], sizes = [2, 32], strides = [1, 1]} : vector<2x128xf32> to vector<2x32xf32>
    %298 = arith.negf %297 : vector<2x32xf32>
    %299 = math.exp %298 : vector<2x32xf32>
    %cst_92 = arith.constant 1.000000e+00 : f32
    %300 = vector.broadcast %cst_92 : f32 to vector<2x32xf32>
    %301 = arith.addf %300, %299 : vector<2x32xf32>
    %302 = arith.divf %300, %301 : vector<2x32xf32>
    %303 = arith.mulf %294, %277 : vector<2x32xf32>
    %304 = arith.mulf %288, %296 : vector<2x32xf32>
    %305 = arith.addf %303, %304 : vector<2x32xf32>
    %306 = math.tanh %305 : vector<2x32xf32>
    %307 = arith.mulf %302, %306 : vector<2x32xf32>
    %c4_93 = arith.constant 4 : index
    %c0_94 = arith.constant 0 : index
    %308 = vector.load %arg10[%c4_93, %c0_94] : memref<16x128xf32, #tpu.memory_space<vmem>>, vector<2x128xf32>
    %cst_95 = arith.constant dense<0.000000e+00> : vector<2x128xf32>
    %309 = tpu.matmul %307, %243, %cst_95 {dimension_numbers = #tpu.dot_dimension_numbers<[1], [0], [0], [1], [0, 0, 1, 1], [], []>} : vector<2x32xf32>, vector<32x128xf32>, vector<2x128xf32> -> vector<2x128xf32>
    %310 = arith.addf %308, %309 : vector<2x128xf32>
    %311 = vector.extract_strided_slice %310 {offsets = [0, 0], sizes = [2, 32], strides = [1, 1]} : vector<2x128xf32> to vector<2x32xf32>
    %312 = arith.negf %311 : vector<2x32xf32>
    %313 = math.exp %312 : vector<2x32xf32>
    %cst_96 = arith.constant 1.000000e+00 : f32
    %314 = vector.broadcast %cst_96 : f32 to vector<2x32xf32>
    %315 = arith.addf %314, %313 : vector<2x32xf32>
    %316 = arith.divf %314, %315 : vector<2x32xf32>
    %317 = vector.extract_strided_slice %310 {offsets = [0, 32], sizes = [2, 32], strides = [1, 1]} : vector<2x128xf32> to vector<2x32xf32>
    %318 = arith.negf %317 : vector<2x32xf32>
    %319 = math.exp %318 : vector<2x32xf32>
    %cst_97 = arith.constant 1.000000e+00 : f32
    %320 = vector.broadcast %cst_97 : f32 to vector<2x32xf32>
    %321 = arith.addf %320, %319 : vector<2x32xf32>
    %322 = arith.divf %320, %321 : vector<2x32xf32>
    %323 = vector.extract_strided_slice %310 {offsets = [0, 64], sizes = [2, 32], strides = [1, 1]} : vector<2x128xf32> to vector<2x32xf32>
    %324 = math.tanh %323 : vector<2x32xf32>
    %325 = vector.extract_strided_slice %310 {offsets = [0, 96], sizes = [2, 32], strides = [1, 1]} : vector<2x128xf32> to vector<2x32xf32>
    %326 = arith.negf %325 : vector<2x32xf32>
    %327 = math.exp %326 : vector<2x32xf32>
    %cst_98 = arith.constant 1.000000e+00 : f32
    %328 = vector.broadcast %cst_98 : f32 to vector<2x32xf32>
    %329 = arith.addf %328, %327 : vector<2x32xf32>
    %330 = arith.divf %328, %329 : vector<2x32xf32>
    %331 = arith.mulf %322, %305 : vector<2x32xf32>
    %332 = arith.mulf %316, %324 : vector<2x32xf32>
    %333 = arith.addf %331, %332 : vector<2x32xf32>
    %334 = math.tanh %333 : vector<2x32xf32>
    %335 = arith.mulf %330, %334 : vector<2x32xf32>
    %c6_99 = arith.constant 6 : index
    %c0_100 = arith.constant 0 : index
    %336 = vector.load %arg10[%c6_99, %c0_100] : memref<16x128xf32, #tpu.memory_space<vmem>>, vector<2x128xf32>
    %cst_101 = arith.constant dense<0.000000e+00> : vector<2x128xf32>
    %337 = tpu.matmul %335, %243, %cst_101 {dimension_numbers = #tpu.dot_dimension_numbers<[1], [0], [0], [1], [0, 0, 1, 1], [], []>} : vector<2x32xf32>, vector<32x128xf32>, vector<2x128xf32> -> vector<2x128xf32>
    %338 = arith.addf %336, %337 : vector<2x128xf32>
    %339 = vector.extract_strided_slice %338 {offsets = [0, 0], sizes = [2, 32], strides = [1, 1]} : vector<2x128xf32> to vector<2x32xf32>
    %340 = arith.negf %339 : vector<2x32xf32>
    %341 = math.exp %340 : vector<2x32xf32>
    %cst_102 = arith.constant 1.000000e+00 : f32
    %342 = vector.broadcast %cst_102 : f32 to vector<2x32xf32>
    %343 = arith.addf %342, %341 : vector<2x32xf32>
    %344 = arith.divf %342, %343 : vector<2x32xf32>
    %345 = vector.extract_strided_slice %338 {offsets = [0, 32], sizes = [2, 32], strides = [1, 1]} : vector<2x128xf32> to vector<2x32xf32>
    %346 = arith.negf %345 : vector<2x32xf32>
    %347 = math.exp %346 : vector<2x32xf32>
    %cst_103 = arith.constant 1.000000e+00 : f32
    %348 = vector.broadcast %cst_103 : f32 to vector<2x32xf32>
    %349 = arith.addf %348, %347 : vector<2x32xf32>
    %350 = arith.divf %348, %349 : vector<2x32xf32>
    %351 = vector.extract_strided_slice %338 {offsets = [0, 64], sizes = [2, 32], strides = [1, 1]} : vector<2x128xf32> to vector<2x32xf32>
    %352 = math.tanh %351 : vector<2x32xf32>
    %353 = vector.extract_strided_slice %338 {offsets = [0, 96], sizes = [2, 32], strides = [1, 1]} : vector<2x128xf32> to vector<2x32xf32>
    %354 = arith.negf %353 : vector<2x32xf32>
    %355 = math.exp %354 : vector<2x32xf32>
    %cst_104 = arith.constant 1.000000e+00 : f32
    %356 = vector.broadcast %cst_104 : f32 to vector<2x32xf32>
    %357 = arith.addf %356, %355 : vector<2x32xf32>
    %358 = arith.divf %356, %357 : vector<2x32xf32>
    %359 = arith.mulf %350, %333 : vector<2x32xf32>
    %360 = arith.mulf %344, %352 : vector<2x32xf32>
    %361 = arith.addf %359, %360 : vector<2x32xf32>
    %362 = math.tanh %361 : vector<2x32xf32>
    %363 = arith.mulf %358, %362 : vector<2x32xf32>
    %c8_105 = arith.constant 8 : index
    %c0_106 = arith.constant 0 : index
    %364 = vector.load %arg10[%c8_105, %c0_106] : memref<16x128xf32, #tpu.memory_space<vmem>>, vector<2x128xf32>
    %cst_107 = arith.constant dense<0.000000e+00> : vector<2x128xf32>
    %365 = tpu.matmul %363, %243, %cst_107 {dimension_numbers = #tpu.dot_dimension_numbers<[1], [0], [0], [1], [0, 0, 1, 1], [], []>} : vector<2x32xf32>, vector<32x128xf32>, vector<2x128xf32> -> vector<2x128xf32>
    %366 = arith.addf %364, %365 : vector<2x128xf32>
    %367 = vector.extract_strided_slice %366 {offsets = [0, 0], sizes = [2, 32], strides = [1, 1]} : vector<2x128xf32> to vector<2x32xf32>
    %368 = arith.negf %367 : vector<2x32xf32>
    %369 = math.exp %368 : vector<2x32xf32>
    %cst_108 = arith.constant 1.000000e+00 : f32
    %370 = vector.broadcast %cst_108 : f32 to vector<2x32xf32>
    %371 = arith.addf %370, %369 : vector<2x32xf32>
    %372 = arith.divf %370, %371 : vector<2x32xf32>
    %373 = vector.extract_strided_slice %366 {offsets = [0, 32], sizes = [2, 32], strides = [1, 1]} : vector<2x128xf32> to vector<2x32xf32>
    %374 = arith.negf %373 : vector<2x32xf32>
    %375 = math.exp %374 : vector<2x32xf32>
    %cst_109 = arith.constant 1.000000e+00 : f32
    %376 = vector.broadcast %cst_109 : f32 to vector<2x32xf32>
    %377 = arith.addf %376, %375 : vector<2x32xf32>
    %378 = arith.divf %376, %377 : vector<2x32xf32>
    %379 = vector.extract_strided_slice %366 {offsets = [0, 64], sizes = [2, 32], strides = [1, 1]} : vector<2x128xf32> to vector<2x32xf32>
    %380 = math.tanh %379 : vector<2x32xf32>
    %381 = vector.extract_strided_slice %366 {offsets = [0, 96], sizes = [2, 32], strides = [1, 1]} : vector<2x128xf32> to vector<2x32xf32>
    %382 = arith.negf %381 : vector<2x32xf32>
    %383 = math.exp %382 : vector<2x32xf32>
    %cst_110 = arith.constant 1.000000e+00 : f32
    %384 = vector.broadcast %cst_110 : f32 to vector<2x32xf32>
    %385 = arith.addf %384, %383 : vector<2x32xf32>
    %386 = arith.divf %384, %385 : vector<2x32xf32>
    %387 = arith.mulf %378, %361 : vector<2x32xf32>
    %388 = arith.mulf %372, %380 : vector<2x32xf32>
    %389 = arith.addf %387, %388 : vector<2x32xf32>
    %390 = math.tanh %389 : vector<2x32xf32>
    %391 = arith.mulf %386, %390 : vector<2x32xf32>
    %c10_111 = arith.constant 10 : index
    %c0_112 = arith.constant 0 : index
    %392 = vector.load %arg10[%c10_111, %c0_112] : memref<16x128xf32, #tpu.memory_space<vmem>>, vector<2x128xf32>
    %cst_113 = arith.constant dense<0.000000e+00> : vector<2x128xf32>
    %393 = tpu.matmul %391, %243, %cst_113 {dimension_numbers = #tpu.dot_dimension_numbers<[1], [0], [0], [1], [0, 0, 1, 1], [], []>} : vector<2x32xf32>, vector<32x128xf32>, vector<2x128xf32> -> vector<2x128xf32>
    %394 = arith.addf %392, %393 : vector<2x128xf32>
    %395 = vector.extract_strided_slice %394 {offsets = [0, 0], sizes = [2, 32], strides = [1, 1]} : vector<2x128xf32> to vector<2x32xf32>
    %396 = arith.negf %395 : vector<2x32xf32>
    %397 = math.exp %396 : vector<2x32xf32>
    %cst_114 = arith.constant 1.000000e+00 : f32
    %398 = vector.broadcast %cst_114 : f32 to vector<2x32xf32>
    %399 = arith.addf %398, %397 : vector<2x32xf32>
    %400 = arith.divf %398, %399 : vector<2x32xf32>
    %401 = vector.extract_strided_slice %394 {offsets = [0, 32], sizes = [2, 32], strides = [1, 1]} : vector<2x128xf32> to vector<2x32xf32>
    %402 = arith.negf %401 : vector<2x32xf32>
    %403 = math.exp %402 : vector<2x32xf32>
    %cst_115 = arith.constant 1.000000e+00 : f32
    %404 = vector.broadcast %cst_115 : f32 to vector<2x32xf32>
    %405 = arith.addf %404, %403 : vector<2x32xf32>
    %406 = arith.divf %404, %405 : vector<2x32xf32>
    %407 = vector.extract_strided_slice %394 {offsets = [0, 64], sizes = [2, 32], strides = [1, 1]} : vector<2x128xf32> to vector<2x32xf32>
    %408 = math.tanh %407 : vector<2x32xf32>
    %409 = vector.extract_strided_slice %394 {offsets = [0, 96], sizes = [2, 32], strides = [1, 1]} : vector<2x128xf32> to vector<2x32xf32>
    %410 = arith.negf %409 : vector<2x32xf32>
    %411 = math.exp %410 : vector<2x32xf32>
    %cst_116 = arith.constant 1.000000e+00 : f32
    %412 = vector.broadcast %cst_116 : f32 to vector<2x32xf32>
    %413 = arith.addf %412, %411 : vector<2x32xf32>
    %414 = arith.divf %412, %413 : vector<2x32xf32>
    %415 = arith.mulf %406, %389 : vector<2x32xf32>
    %416 = arith.mulf %400, %408 : vector<2x32xf32>
    %417 = arith.addf %415, %416 : vector<2x32xf32>
    %418 = math.tanh %417 : vector<2x32xf32>
    %419 = arith.mulf %414, %418 : vector<2x32xf32>
    %c12_117 = arith.constant 12 : index
    %c0_118 = arith.constant 0 : index
    %420 = vector.load %arg10[%c12_117, %c0_118] : memref<16x128xf32, #tpu.memory_space<vmem>>, vector<2x128xf32>
    %cst_119 = arith.constant dense<0.000000e+00> : vector<2x128xf32>
    %421 = tpu.matmul %419, %243, %cst_119 {dimension_numbers = #tpu.dot_dimension_numbers<[1], [0], [0], [1], [0, 0, 1, 1], [], []>} : vector<2x32xf32>, vector<32x128xf32>, vector<2x128xf32> -> vector<2x128xf32>
    %422 = arith.addf %420, %421 : vector<2x128xf32>
    %423 = vector.extract_strided_slice %422 {offsets = [0, 0], sizes = [2, 32], strides = [1, 1]} : vector<2x128xf32> to vector<2x32xf32>
    %424 = arith.negf %423 : vector<2x32xf32>
    %425 = math.exp %424 : vector<2x32xf32>
    %cst_120 = arith.constant 1.000000e+00 : f32
    %426 = vector.broadcast %cst_120 : f32 to vector<2x32xf32>
    %427 = arith.addf %426, %425 : vector<2x32xf32>
    %428 = arith.divf %426, %427 : vector<2x32xf32>
    %429 = vector.extract_strided_slice %422 {offsets = [0, 32], sizes = [2, 32], strides = [1, 1]} : vector<2x128xf32> to vector<2x32xf32>
    %430 = arith.negf %429 : vector<2x32xf32>
    %431 = math.exp %430 : vector<2x32xf32>
    %cst_121 = arith.constant 1.000000e+00 : f32
    %432 = vector.broadcast %cst_121 : f32 to vector<2x32xf32>
    %433 = arith.addf %432, %431 : vector<2x32xf32>
    %434 = arith.divf %432, %433 : vector<2x32xf32>
    %435 = vector.extract_strided_slice %422 {offsets = [0, 64], sizes = [2, 32], strides = [1, 1]} : vector<2x128xf32> to vector<2x32xf32>
    %436 = math.tanh %435 : vector<2x32xf32>
    %437 = vector.extract_strided_slice %422 {offsets = [0, 96], sizes = [2, 32], strides = [1, 1]} : vector<2x128xf32> to vector<2x32xf32>
    %438 = arith.negf %437 : vector<2x32xf32>
    %439 = math.exp %438 : vector<2x32xf32>
    %cst_122 = arith.constant 1.000000e+00 : f32
    %440 = vector.broadcast %cst_122 : f32 to vector<2x32xf32>
    %441 = arith.addf %440, %439 : vector<2x32xf32>
    %442 = arith.divf %440, %441 : vector<2x32xf32>
    %443 = arith.mulf %434, %417 : vector<2x32xf32>
    %444 = arith.mulf %428, %436 : vector<2x32xf32>
    %445 = arith.addf %443, %444 : vector<2x32xf32>
    %446 = math.tanh %445 : vector<2x32xf32>
    %447 = arith.mulf %442, %446 : vector<2x32xf32>
    %c14_123 = arith.constant 14 : index
    %c0_124 = arith.constant 0 : index
    %448 = vector.load %arg10[%c14_123, %c0_124] : memref<16x128xf32, #tpu.memory_space<vmem>>, vector<2x128xf32>
    %cst_125 = arith.constant dense<0.000000e+00> : vector<2x128xf32>
    %449 = tpu.matmul %447, %243, %cst_125 {dimension_numbers = #tpu.dot_dimension_numbers<[1], [0], [0], [1], [0, 0, 1, 1], [], []>} : vector<2x32xf32>, vector<32x128xf32>, vector<2x128xf32> -> vector<2x128xf32>
    %450 = arith.addf %448, %449 : vector<2x128xf32>
    %451 = vector.extract_strided_slice %450 {offsets = [0, 0], sizes = [2, 32], strides = [1, 1]} : vector<2x128xf32> to vector<2x32xf32>
    %452 = arith.negf %451 : vector<2x32xf32>
    %453 = math.exp %452 : vector<2x32xf32>
    %cst_126 = arith.constant 1.000000e+00 : f32
    %454 = vector.broadcast %cst_126 : f32 to vector<2x32xf32>
    %455 = arith.addf %454, %453 : vector<2x32xf32>
    %456 = arith.divf %454, %455 : vector<2x32xf32>
    %457 = vector.extract_strided_slice %450 {offsets = [0, 32], sizes = [2, 32], strides = [1, 1]} : vector<2x128xf32> to vector<2x32xf32>
    %458 = arith.negf %457 : vector<2x32xf32>
    %459 = math.exp %458 : vector<2x32xf32>
    %cst_127 = arith.constant 1.000000e+00 : f32
    %460 = vector.broadcast %cst_127 : f32 to vector<2x32xf32>
    %461 = arith.addf %460, %459 : vector<2x32xf32>
    %462 = arith.divf %460, %461 : vector<2x32xf32>
    %463 = vector.extract_strided_slice %450 {offsets = [0, 64], sizes = [2, 32], strides = [1, 1]} : vector<2x128xf32> to vector<2x32xf32>
    %464 = math.tanh %463 : vector<2x32xf32>
    %465 = vector.extract_strided_slice %450 {offsets = [0, 96], sizes = [2, 32], strides = [1, 1]} : vector<2x128xf32> to vector<2x32xf32>
    %466 = arith.negf %465 : vector<2x32xf32>
    %467 = math.exp %466 : vector<2x32xf32>
    %cst_128 = arith.constant 1.000000e+00 : f32
    %468 = vector.broadcast %cst_128 : f32 to vector<2x32xf32>
    %469 = arith.addf %468, %467 : vector<2x32xf32>
    %470 = arith.divf %468, %469 : vector<2x32xf32>
    %471 = arith.mulf %462, %445 : vector<2x32xf32>
    %472 = arith.mulf %456, %464 : vector<2x32xf32>
    %473 = arith.addf %471, %472 : vector<2x32xf32>
    %474 = math.tanh %473 : vector<2x32xf32>
    %475 = arith.mulf %470, %474 : vector<2x32xf32>
    %c0_129 = arith.constant 0 : index
    %c0_130 = arith.constant 0 : index
    %476 = vector.load %arg7[%c0_129, %c0_130] : memref<32x4xf32, #tpu.memory_space<vmem>>, vector<32x4xf32>
    %cst_131 = arith.constant dense<0.000000e+00> : vector<2x4xf32>
    %477 = tpu.matmul %475, %476, %cst_131 {dimension_numbers = #tpu.dot_dimension_numbers<[1], [0], [0], [1], [0, 0, 1, 1], [], []>} : vector<2x32xf32>, vector<32x4xf32>, vector<2x4xf32> -> vector<2x4xf32>
    %c0_132 = arith.constant 0 : index
    %c0_133 = arith.constant 0 : index
    %478 = vector.load %arg8[%c0_132, %c0_133] : memref<1x4xf32, #tpu.memory_space<vmem>>, vector<1x4xf32>
    %479 = vector.broadcast %478 : vector<1x4xf32> to vector<2x4xf32>
    %480 = arith.addf %477, %479 : vector<2x4xf32>
    %c0_134 = arith.constant 0 : index
    %c0_135 = arith.constant 0 : index
    %481 = vector.load %arg9[%c0_134, %c0_135] : memref<2x4xf32, #tpu.memory_space<vmem>>, vector<2x4xf32>
    tpu.vector_store %arg9[%c0_134, %c0_135], %480 {strides = array<i32>} : memref<2x4xf32, #tpu.memory_space<vmem>>, vector<2x4xf32>,
    return
  }
}

</mosaic_0001>

<bundles_post_ra>
// kernel: lstm_forward.1
= control target key start
LH: loop header
LB: loop body
LE: loop exit
PB: predicated region body
PF: predicated region fallthrough
CT: control target
= control target key end

     0   :  { %14 = vsyncpa [#allocation5], 0  ;;  %s2929_s0 = inlined_call_operand.vmem [shape: f32[16,16], index: 0, kind: input, shape index: {}]   ;;  %s2930_s1 = inlined_call_operand.hbm [shape: f32[16,128], index: 1, kind: input, shape index: {}]   ;;  %s2931_s2 = inlined_call_operand.vmem [shape: f32[32,128], index: 2, kind: input, shape index: {}]   ;;  %s2932_s3 = inlined_call_operand.vmem [shape: f32[1,128], index: 3, kind: input, shape index: {}]   ;;  %s2933_s4 = inlined_call_operand.vmem [shape: f32[32,128], index: 4, kind: input, shape index: {}]   ;;  %s2934_s5 = inlined_call_operand.hbm [shape: f32[32,128], index: 5, kind: input, shape index: {}]   ;;  %s2935_s6 = inlined_call_operand.vmem [shape: f32[1,128], index: 6, kind: input, shape index: {}]   ;;  %s2936_s7 = inlined_call_operand.vmem [shape: f32[32,4], index: 7, kind: input, shape index: {}]   ;;  %s2937_s8 = inlined_call_operand.vmem [shape: f32[1,4], index: 8, kind: input, shape index: {}]   ;;  %s2938_s9 = inlined_call_operand.hbm [shape: f32[2,4], index: 9, kind: output, shape index: {}]  }
   0x1   :  { %15 = vsyncpa [#allocation8], 0 }
   0x2   :  { %16 = vsyncpa [#allocation6], 0  ;;  %s2535_s30 = smov [#allocation4]  }
   0x3   :  { %s24_s10 = sshll.u32 %s2535_s30, 4  ;;  %s25_s10 = int_to_ptr.vmem [resolvable:$true] %s24_s10 }
   0x4   :  { %s2477_s11 = scalar_lea.vmem %s25_s10, 256  ;;  %p2482_p1 = scmp.lt.s32.totalorder %s25_s10, %s25_s10 }
   0x5   :  { %p2478_p0 = scmp.ne.s32.totalorder %s25_s10, %s2477_s11  ;;  %p2483_p2 = scmp.lt.s32.totalorder %s2477_s11, %s2477_s11 }
   0x7   :  { %p2484_p3 = por %p2483_p2, %p2482_p1 }
   0x9   :  { %p2485_p4 = pnand %p2484_p3, %p2478_p0 }
   0xb   :  { %2488 = shalt.err (!%p2485_p4)
}
   0xc   :  { %s2536_s12 = smov 128   ;;  %s2537_s13 = smov 8  }
   0xd   :  { %30 = dma.hbm_to_vmem [thread:$0]  %s2930_s1, 256, %s25_s10, [#allocation5], %s2536_s12, %s2536_s12, %s2537_s13  }
   0xe   :  { %s2538_s16 = smov [#allocation7]  }
   0xf   :  { %s42_s17 = sshll.u32 %s2538_s16, 4  ;;  %s43_s17 = int_to_ptr.vmem [resolvable:$true] %s42_s17 }
  0x10   :  { %s2497_s18 = scalar_lea.vmem %s43_s17, 512  ;;  %p2502_p6 = scmp.lt.s32.totalorder %s43_s17, %s43_s17 }
  0x11   :  { %p2498_p5 = scmp.ne.s32.totalorder %s43_s17, %s2497_s18  ;;  %p2503_p7 = scmp.lt.s32.totalorder %s2497_s18, %s2497_s18 }
  0x13   :  { %p2504_p8 = por %p2503_p7, %p2502_p6 }
  0x15   :  { %p2505_p9 = pnand %p2504_p8, %p2498_p5 }
  0x17   :  { %2508 = shalt.err (!%p2505_p9)
}
  0x18   :  { %48 = dma.hbm_to_vmem [thread:$0]  %s2934_s5, 512, %s43_s17, [#allocation8], %s2536_s12, %s2536_s12, %s2537_s13  }
  0x19   :  { %2529 = dma.done.wait [#allocation5], 256  }
  0x1a   :  { %2530 = vsyncadd [#allocation5], 4294967040 }
  0x1b   :  { %2531 = dma.done.wait [#allocation8], 512  }
  0x1c   :  { %2532 = vsyncadd [#allocation8], 4294966784  ;;  %v2539_v0 = vmov 0.0   ;;  %vm2540_vm0 = vmmov 0   ;;  %vm76_vm1 = vcmask 130048   ;;  %v62_v1 = vld [vmem:[#allocation4 + $0x8] sm:$0xff] }
  0x1d   :  { %2134 = vmatprep.subr.mxu1 %v2539_v0  ;;  %2142 = vmatprep.mubr.msk.f32.mxu1 %vm2540_vm0, %v2539_v0  ;;  %v61_v2 = vld [vmem:[#allocation4] sm:$0xff]  ;;  %v2610_v4 = vld [vmem:[%s2931_s2 + $0x18] sm:$0xff]  ;;  %v2615_v5 = vld [vmem:[%s2931_s2 + $0x10] sm:$0xff]  ;;  %s2541_s10 = smov 64   ;;  %vm264_vm2 = vcmask 254976   ;;  %vm161_vm3 = vcmask 261120  }
  0x1e   :  { %v68_v3 = vld [vmem:[%s2929_s0] sm:$0xff]  ;;  %2127 = vmatprep.subr.mxu0 %v62_v1  ;;  %v69_v6 = vld [vmem:[%s2929_s0 + $0x8] sm:$0xff]  ;;  %2135 = vmatpush3.msra.mxu1 %v2610_v4  ;;  %s2543_s27 = smov [#allocation9]   ;;  %vm1976_vm4 = vcmask 25600  }
  0x1f   :  { %2131 = vmatprep.mubr.msk.f32.mxu0 %vm76_vm1, %v68_v3  ;;  %2128 = vmatpush3.msra.mxu0 %v62_v1  ;;  %v2625_v7 = vld [vmem:[%s2931_s2 + $0x8] sm:$0xff]  ;;  %v2633_v8 = vld [vmem:[%s2931_s2] sm:$0xff] }
  0x20   :  { %2129 = vmatprep.subr.mxu0 %v61_v2  ;;  %2136 = vmatprep.subr.mxu1 %v2539_v0  ;;  %v1994_v9 = vld [vmem:[%s2932_s3] ss:$0 sm:$0xff]  ;;  %s2542_s3 = smov 32  }
  0x21   :  { %2130 = vmatpush3.msra.mxu0 %v61_v2  ;;  %2137 = vmatpush3.msra.mxu1 %v2615_v5 }
  0x22   :  { %2132 = vmatmul.mubr.msk.f32.vlgmr.msra.gmra.mxu0 %vm76_vm1, %v69_v6  ;;  %2138 = vmatprep.subr.mxu1 %v2539_v0 }
  0x23   :  { %2139 = vmatpush3.msra.mxu1 %v2625_v7  ;;  %2145 = vmatprep.subr.mxu0 %v2539_v0 }
  0x24   :  { %2140 = vmatprep.subr.mxu1 %v2539_v0  ;;  %2146 = vmatpush3.msra.mxu0 %v2610_v4 }
  0x25   :  { %2141 = vmatpush3.msra.mxu1 %v2633_v8  ;;  %2147 = vmatprep.subr.mxu0 %v2539_v0 }
  0x26   :  { %2143 = vmatmul.mubr.f32.vlgmr.msra.gmra.mxu1 %v2539_v0  ;;  %2148 = vmatpush3.msra.mxu0 %v2615_v5 }
  0x27   :  { %2149 = vmatprep.subr.mxu0 %v2539_v0  ;;  %2153 = vmatprep.mubr.msk.f32.mxu0 %vm2540_vm0, %v2539_v0 }
  0x28   :  { %2150 = vmatpush3.msra.mxu0 %v2625_v7  ;;  %2156 = vmatprep.subr.mxu1 %v2539_v0 }
  0x29   :  { %2151 = vmatprep.subr.mxu0 %v2539_v0  ;;  %2157 = vmatpush3.msra.mxu1 %v2610_v4 }
  0x2a   :  { %2152 = vmatpush3.msra.mxu0 %v2633_v8  ;;  %2158 = vmatprep.subr.mxu1 %v2539_v0 }
  0x2b   :  { %2159 = vmatpush3.msra.mxu1 %v2615_v5  ;;  %2164 = vmatprep.mubr.msk.f32.mxu1 %vm2540_vm0, %v2539_v0 }
  0x2c   :  { %2160 = vmatprep.subr.mxu1 %v2539_v0  ;;  %2167 = vmatprep.subr.mxu0 %v2539_v0 }
  0x2d   :  { %2161 = vmatpush3.msra.mxu1 %v2625_v7 }
  0x2e   :  { %2162 = vmatprep.subr.mxu1 %v2539_v0 }
  0x2f   :  { %2163 = vmatpush3.msra.mxu1 %v2633_v8 }
  0x30   :  { %2178 = vmatprep.subr.mxu1 %v2539_v0 }
  0xe2   :  { %v2133_v10 = vpop.f32.mrf.mxu0 }
  0xe3   :  { %v155_v11 = vadd.f32 %v2133_v10, %v1994_v9 }
  0xe4   :  { %v149_v12 = vpop.f32.mrf.mxu0 }
  0xe5   :  { %159 = vst [vmem:[#allocation2 + $0x8] sm:$0xff] %v155_v11  ;;  %v150_v13 = vadd.f32 %v1994_v9, %v149_v12 }
  0xe6   :  { %v231_v14 = vpop.f32.mrf.mxu1 }
  0xe7   :  { %158 = vst [vmem:[#allocation2] sm:$0xff] %v150_v13 }
  0xe8   :  { %v2144_v15 = vpop.f32.mrf.mxu1 }
  0xee   :  { %v160_v16 = vld [vmem:[#allocation2] sm:$0x3]  ;;  %v266_v32 = vld [vmem:[#allocation2 + $0x2] sm:$0x3]  ;;  %v369_v50 = vld [vmem:[#allocation2 + $0x4] sm:$0x3] }
  0xef   :  { %v235_v17 = vadd.f32 %v231_v14, %v160_v16  ;;  %v472_v9 = vld [vmem:[#allocation2 + $0x6] sm:$0x3] }
  0xf1   :  { %2341 = vtanh.f32 %v235_v17  ;;  %v1997_v19 = vmul.f32 -1.442695, %v235_v17 }
  0xf3   :  { %2343 = vpow2.f32 %v1997_v19 }
  0xfe   :  { %v2342_v18 = vpop.eup %2341 }
  0xff   :  { %245 = vrot.lane.b32.xlu0 %v2342_v18, %s2541_s10 }
 0x100   :  { %v2344_v20 = vpop.eup %2343 }
 0x101   :  { %v239_v21 = vadd.f32 1.0, %v2344_v20 }
 0x103   :  { %2345 = vrcp.f32 %v239_v21 }
 0x110   :  { %v2346_v22 = vpop.eup %2345 }
 0x111   :  { %v243_v25 = vmul.f32 0.0, %v2346_v22 }
 0x171   :  { %v246_v23 = vpop.permute.xlu0 %245 }
 0x172   :  { %v248_v24 = vmul.f32 %v2346_v22, %v246_v23 }
 0x174   :  { %250 = vrot.lane.b32.xlu0 %v248_v24, %s2542_s3 }
 0x1e6   :  { %v251_v26 = vpop.permute.xlu0 %250 }
 0x1e7   :  { %v253_v27 = vadd.f32 %v251_v26, %v243_v25 }
 0x1e9   :  { %2347 = vtanh.f32 %v253_v27 }
 0x1f6   :  { %v2348_v28 = vpop.eup %2347 }
 0x1f7   :  { %256 = vrot.lane.b32.xlu1 %v2348_v28, %s2541_s10 }
 0x269   :  { %v257_v29 = vpop.permute.xlu1 %256 }
 0x26a   :  { %v259_v30 = vmul.f32 %v2346_v22, %v257_v29 }
 0x26c   :  { %261 = vrot.lane.b32.xlu1 %v259_v30, %s2542_s3 }
 0x2de   :  { %v262_v31 = vpop.permute.xlu1 %261 }
 0x2df   :  { %265 = vst.msk [vmem:[#allocation3] sm:$0x3] %vm264_vm2, %v262_v31  ;;  %2154 = vmatmul.mubr.msk.f32.vlgmr.msra.gmra.mxu0 %vm161_vm3, %v262_v31 }
 0x2e0   :  { %2168 = vmatpush3.msra.mxu0 %v2610_v4  ;;  %2175 = vmatprep.mubr.msk.f32.mxu0 %vm2540_vm0, %v2539_v0 }
 0x2e1   :  { %2169 = vmatprep.subr.mxu0 %v2539_v0 }
 0x2e2   :  { %2170 = vmatpush3.msra.mxu0 %v2615_v5 }
 0x2e3   :  { %2171 = vmatprep.subr.mxu0 %v2539_v0 }
 0x2e4   :  { %2172 = vmatpush3.msra.mxu0 %v2625_v7 }
 0x2e5   :  { %2173 = vmatprep.subr.mxu0 %v2539_v0 }
 0x2e6   :  { %2174 = vmatpush3.msra.mxu0 %v2633_v8 }
 0x2e7   :  { %2189 = vmatprep.subr.mxu0 %v2539_v0 }
 0x39f   :  { %v335_v33 = vpop.f32.mrf.mxu0 }
 0x3a0   :  { %v339_v34 = vadd.f32 %v335_v33, %v266_v32 }
 0x3a1   :  { %v2155_v35 = vpop.f32.mrf.mxu0 }
 0x3a2   :  { %2349 = vtanh.f32 %v339_v34  ;;  %v1999_v37 = vmul.f32 -1.442695, %v339_v34 }
 0x3a4   :  { %2351 = vpow2.f32 %v1999_v37 }
 0x3af   :  { %v2350_v36 = vpop.eup %2349 }
 0x3b0   :  { %349 = vrot.lane.b32.xlu0 %v2350_v36, %s2541_s10 }
 0x3b1   :  { %v2352_v38 = vpop.eup %2351 }
 0x3b2   :  { %v343_v39 = vadd.f32 1.0, %v2352_v38 }
 0x3b4   :  { %2353 = vrcp.f32 %v343_v39 }
 0x3c1   :  { %v2354_v40 = vpop.eup %2353 }
 0x3c2   :  { %v347_v43 = vmul.f32 %v2354_v40, %v253_v27  ;;  %v575_v27 = vld [vmem:[#allocation2 + $0x8] sm:$0x3] }
 0x422   :  { %v350_v41 = vpop.permute.xlu0 %349 }
 0x423   :  { %v352_v42 = vmul.f32 %v2354_v40, %v350_v41 }
 0x425   :  { %354 = vrot.lane.b32.xlu1 %v352_v42, %s2542_s3 }
 0x497   :  { %v355_v44 = vpop.permute.xlu1 %354 }
 0x498   :  { %v357_v45 = vadd.f32 %v355_v44, %v347_v43 }
 0x49a   :  { %2355 = vtanh.f32 %v357_v45 }
 0x4a7   :  { %v2356_v46 = vpop.eup %2355 }
 0x4a8   :  { %360 = vrot.lane.b32.xlu0 %v2356_v46, %s2541_s10 }
 0x51a   :  { %v361_v47 = vpop.permute.xlu0 %360 }
 0x51b   :  { %v363_v48 = vmul.f32 %v2354_v40, %v361_v47 }
 0x51d   :  { %365 = vrot.lane.b32.xlu1 %v363_v48, %s2542_s3 }
 0x58f   :  { %v366_v49 = vpop.permute.xlu1 %365 }
 0x590   :  { %368 = vst.msk [vmem:[#allocation3 + $0x2] sm:$0x3] %vm264_vm2, %v366_v49  ;;  %2165 = vmatmul.mubr.msk.f32.vlgmr.msra.gmra.mxu1 %vm161_vm3, %v366_v49 }
 0x591   :  { %2179 = vmatpush3.msra.mxu1 %v2610_v4  ;;  %2186 = vmatprep.mubr.msk.f32.mxu1 %vm2540_vm0, %v2539_v0 }
 0x592   :  { %2180 = vmatprep.subr.mxu1 %v2539_v0 }
 0x593   :  { %2181 = vmatpush3.msra.mxu1 %v2615_v5 }
 0x594   :  { %2182 = vmatprep.subr.mxu1 %v2539_v0 }
 0x595   :  { %2183 = vmatpush3.msra.mxu1 %v2625_v7 }
 0x596   :  { %2184 = vmatprep.subr.mxu1 %v2539_v0 }
 0x597   :  { %2185 = vmatpush3.msra.mxu1 %v2633_v8 }
 0x598   :  { %2200 = vmatprep.subr.mxu1 %v2539_v0 }
 0x650   :  { %v438_v51 = vpop.f32.mrf.mxu1 }
 0x651   :  { %v442_v52 = vadd.f32 %v438_v51, %v369_v50 }
 0x652   :  { %v2166_v53 = vpop.f32.mrf.mxu1 }
 0x653   :  { %2357 = vtanh.f32 %v442_v52  ;;  %v2001_v55 = vmul.f32 -1.442695, %v442_v52 }
 0x655   :  { %2359 = vpow2.f32 %v2001_v55 }
 0x660   :  { %v2358_v54 = vpop.eup %2357 }
 0x661   :  { %452 = vrot.lane.b32.xlu0 %v2358_v54, %s2541_s10 }
 0x662   :  { %v2360_v56 = vpop.eup %2359 }
 0x663   :  { %v446_v57 = vadd.f32 1.0, %v2360_v56 }
 0x665   :  { %2361 = vrcp.f32 %v446_v57 }
 0x672   :  { %v2362_v58 = vpop.eup %2361 }
 0x673   :  { %v450_v61 = vmul.f32 %v2362_v58, %v357_v45  ;;  %v678_v45 = vld [vmem:[#allocation2 + $0xa] sm:$0x3] }
 0x6d3   :  { %v453_v59 = vpop.permute.xlu0 %452 }
 0x6d4   :  { %v455_v60 = vmul.f32 %v2362_v58, %v453_v59 }
 0x6d6   :  { %457 = vrot.lane.b32.xlu1 %v455_v60, %s2542_s3  ;;  %v781_v60 = vld [vmem:[#allocation2 + $0xc] sm:$0x3] }
 0x748   :  { %v458_v62 = vpop.permute.xlu1 %457 }
 0x749   :  { %v460_v63 = vadd.f32 %v458_v62, %v450_v61 }
 0x74b   :  { %2363 = vtanh.f32 %v460_v63 }
 0x758   :  { %v2364_v1 = vpop.eup %2363 }
 0x759   :  { %463 = vrot.lane.b32.xlu0 %v2364_v1, %s2541_s10 }
 0x7cb   :  { %v464_v2 = vpop.permute.xlu0 %463 }
 0x7cc   :  { %v466_v3 = vmul.f32 %v2362_v58, %v464_v2 }
 0x7ce   :  { %468 = vrot.lane.b32.xlu1 %v466_v3, %s2542_s3 }
 0x840   :  { %v469_v6 = vpop.permute.xlu1 %468 }
 0x841   :  { %471 = vst.msk [vmem:[#allocation3 + $0x4] sm:$0x3] %vm264_vm2, %v469_v6  ;;  %2176 = vmatmul.mubr.msk.f32.vlgmr.msra.gmra.mxu0 %vm161_vm3, %v469_v6 }
 0x842   :  { %2190 = vmatpush3.msra.mxu0 %v2610_v4  ;;  %2197 = vmatprep.mubr.msk.f32.mxu0 %vm2540_vm0, %v2539_v0 }
 0x843   :  { %2191 = vmatprep.subr.mxu0 %v2539_v0 }
 0x844   :  { %2192 = vmatpush3.msra.mxu0 %v2615_v5 }
 0x845   :  { %2193 = vmatprep.subr.mxu0 %v2539_v0 }
 0x846   :  { %2194 = vmatpush3.msra.mxu0 %v2625_v7 }
 0x847   :  { %2195 = vmatprep.subr.mxu0 %v2539_v0 }
 0x848   :  { %2196 = vmatpush3.msra.mxu0 %v2633_v8 }
 0x849   :  { %2211 = vmatprep.subr.mxu0 %v2539_v0 }
 0x901   :  { %v541_v10 = vpop.f32.mrf.mxu0 }
 0x902   :  { %v545_v11 = vadd.f32 %v541_v10, %v472_v9 }
 0x903   :  { %v2177_v12 = vpop.f32.mrf.mxu0 }
 0x904   :  { %2365 = vtanh.f32 %v545_v11  ;;  %v2003_v14 = vmul.f32 -1.442695, %v545_v11 }
 0x906   :  { %2367 = vpow2.f32 %v2003_v14 }
 0x911   :  { %v2366_v13 = vpop.eup %2365 }
 0x912   :  { %555 = vrot.lane.b32.xlu0 %v2366_v13, %s2541_s10 }
 0x913   :  { %v2368_v15 = vpop.eup %2367 }
 0x914   :  { %v549_v16 = vadd.f32 1.0, %v2368_v15 }
 0x916   :  { %2369 = vrcp.f32 %v549_v16 }
 0x923   :  { %v2370_v17 = vpop.eup %2369 }
 0x924   :  { %v553_v20 = vmul.f32 %v2370_v17, %v460_v63 }
 0x984   :  { %v556_v18 = vpop.permute.xlu0 %555 }
 0x985   :  { %v558_v19 = vmul.f32 %v2370_v17, %v556_v18 }
 0x987   :  { %560 = vrot.lane.b32.xlu1 %v558_v19, %s2542_s3  ;;  %v884_v19 = vld [vmem:[#allocation2 + $0xe] sm:$0x3] }
 0x9f9   :  { %v561_v21 = vpop.permute.xlu1 %560 }
 0x9fa   :  { %v563_v22 = vadd.f32 %v561_v21, %v553_v20 }
 0x9fc   :  { %2371 = vtanh.f32 %v563_v22 }
 0xa09   :  { %v2372_v23 = vpop.eup %2371 }
 0xa0a   :  { %566 = vrot.lane.b32.xlu0 %v2372_v23, %s2541_s10 }
 0xa7c   :  { %v567_v24 = vpop.permute.xlu0 %566 }
 0xa7d   :  { %v569_v25 = vmul.f32 %v2370_v17, %v567_v24 }
 0xa7f   :  { %571 = vrot.lane.b32.xlu1 %v569_v25, %s2542_s3 }
 0xaf1   :  { %v572_v26 = vpop.permute.xlu1 %571 }
 0xaf2   :  { %574 = vst.msk [vmem:[#allocation3 + $0x6] sm:$0x3] %vm264_vm2, %v572_v26  ;;  %2187 = vmatmul.mubr.msk.f32.vlgmr.msra.gmra.mxu1 %vm161_vm3, %v572_v26 }
 0xaf3   :  { %2201 = vmatpush3.msra.mxu1 %v2610_v4  ;;  %2208 = vmatprep.mubr.msk.f32.mxu1 %vm2540_vm0, %v2539_v0 }
 0xaf4   :  { %2202 = vmatprep.subr.mxu1 %v2539_v0 }
 0xaf5   :  { %2203 = vmatpush3.msra.mxu1 %v2615_v5 }
 0xaf6   :  { %2204 = vmatprep.subr.mxu1 %v2539_v0 }
 0xaf7   :  { %2205 = vmatpush3.msra.mxu1 %v2625_v7 }
 0xaf8   :  { %2206 = vmatprep.subr.mxu1 %v2539_v0 }
 0xaf9   :  { %2207 = vmatpush3.msra.mxu1 %v2633_v8  ;;  %v996_v59 = vld [vmem:[#allocation3] sm:$0xff] }
 0xbb2   :  { %v644_v28 = vpop.f32.mrf.mxu1 }
 0xbb3   :  { %v648_v29 = vadd.f32 %v644_v28, %v575_v27 }
 0xbb4   :  { %v2188_v30 = vpop.f32.mrf.mxu1 }
 0xbb5   :  { %2373 = vtanh.f32 %v648_v29  ;;  %v2005_v32 = vmul.f32 -1.442695, %v648_v29 }
 0xbb7   :  { %2375 = vpow2.f32 %v2005_v32 }
 0xbc2   :  { %v2374_v31 = vpop.eup %2373 }
 0xbc3   :  { %658 = vrot.lane.b32.xlu0 %v2374_v31, %s2541_s10 }
 0xbc4   :  { %v2376_v33 = vpop.eup %2375 }
 0xbc5   :  { %v652_v34 = vadd.f32 1.0, %v2376_v33 }
 0xbc7   :  { %2377 = vrcp.f32 %v652_v34  ;;  %v990_v34 = vld [vmem:[%s2933_s4 + $0x18] sm:$0xff] }
 0xbc8   :  { %2222 = vmatprep.subr.mxu1 %v990_v34 }
 0xbd4   :  { %v2378_v35 = vpop.eup %2377 }
 0xbd5   :  { %v656_v38 = vmul.f32 %v2378_v35, %v563_v22 }
 0xc35   :  { %v659_v36 = vpop.permute.xlu0 %658 }
 0xc36   :  { %v661_v37 = vmul.f32 %v2378_v35, %v659_v36  ;;  %v988_v36 = vld [vmem:[%s2933_s4 + $0x8] sm:$0xff] }
 0xc38   :  { %663 = vrot.lane.b32.xlu1 %v661_v37, %s2542_s3  ;;  %v987_v37 = vld [vmem:[%s2933_s4] sm:$0xff] }
 0xcaa   :  { %v664_v39 = vpop.permute.xlu1 %663 }
 0xcab   :  { %v666_v40 = vadd.f32 %v664_v39, %v656_v38  ;;  %v2773_v38 = vld [vmem:[#allocation7 + $0x18] sm:$0xff]  ;;  %v2775_v39 = vld [vmem:[#allocation7 + $0x10] sm:$0xff] }
 0xcad   :  { %2379 = vtanh.f32 %v666_v40 }
 0xcba   :  { %v2380_v41 = vpop.eup %2379 }
 0xcbb   :  { %669 = vrot.lane.b32.xlu0 %v2380_v41, %s2541_s10  ;;  %v2780_v41 = vld [vmem:[#allocation7 + $0x8] sm:$0xff] }
 0xd2d   :  { %v670_v42 = vpop.permute.xlu0 %669 }
 0xd2e   :  { %v672_v43 = vmul.f32 %v2378_v35, %v670_v42  ;;  %v989_v35 = vld [vmem:[%s2933_s4 + $0x10] sm:$0xff] }
 0xd30   :  { %674 = vrot.lane.b32.xlu1 %v672_v43, %s2542_s3  ;;  %v2784_v43 = vld [vmem:[#allocation7] sm:$0xff] }
 0xda2   :  { %v675_v44 = vpop.permute.xlu1 %674 }
 0xda3   :  { %677 = vst.msk [vmem:[#allocation3 + $0x8] sm:$0x3] %vm264_vm2, %v675_v44  ;;  %2198 = vmatmul.mubr.msk.f32.vlgmr.msra.gmra.mxu0 %vm161_vm3, %v675_v44 }
 0xda4   :  { %2212 = vmatpush3.msra.mxu0 %v2610_v4  ;;  %2219 = vmatprep.mubr.msk.f32.mxu0 %vm2540_vm0, %v2539_v0 }
 0xda5   :  { %2213 = vmatprep.subr.mxu0 %v2539_v0 }
 0xda6   :  { %2214 = vmatpush3.msra.mxu0 %v2615_v5 }
 0xda7   :  { %2215 = vmatprep.subr.mxu0 %v2539_v0 }
 0xda8   :  { %2216 = vmatpush3.msra.mxu0 %v2625_v7 }
 0xda9   :  { %2217 = vmatprep.subr.mxu0 %v2539_v0 }
 0xdaa   :  { %2218 = vmatpush3.msra.mxu0 %v2633_v8 }
 0xdab   :  { %2233 = vmatprep.subr.mxu0 %v2539_v0 }
 0xe63   :  { %v747_v46 = vpop.f32.mrf.mxu0 }
 0xe64   :  { %v751_v4 = vadd.f32 %v747_v46, %v678_v45 }
 0xe65   :  { %v2199_v47 = vpop.f32.mrf.mxu0 }
 0xe66   :  { %2381 = vtanh.f32 %v751_v4  ;;  %v2007_v49 = vmul.f32 -1.442695, %v751_v4  ;;  %v2012_v47 = vld [vmem:[%s2935_s6] ss:$0 sm:$0xff] }
 0xe68   :  { %2383 = vpow2.f32 %v2007_v49 }
 0xe73   :  { %v2382_v48 = vpop.eup %2381 }
 0xe74   :  { %761 = vrot.lane.b32.xlu0 %v2382_v48, %s2541_s10 }
 0xe75   :  { %v2384_v5 = vpop.eup %2383 }
 0xe76   :  { %v755_v50 = vadd.f32 1.0, %v2384_v5 }
 0xe78   :  { %2385 = vrcp.f32 %v755_v50 }
 0xe85   :  { %v2386_v7 = vpop.eup %2385 }
 0xe86   :  { %v759_v8 = vmul.f32 %v2386_v7, %v666_v40 }
 0xee6   :  { %v762_v51 = vpop.permute.xlu0 %761 }
 0xee7   :  { %v764_v52 = vmul.f32 %v2386_v7, %v762_v51 }
 0xee9   :  { %766 = vrot.lane.b32.xlu1 %v764_v52, %s2542_s3 }
 0xf5b   :  { %v767_v53 = vpop.permute.xlu1 %766 }
 0xf5c   :  { %v769_v54 = vadd.f32 %v767_v53, %v759_v8 }
 0xf5e   :  { %2387 = vtanh.f32 %v769_v54 }
 0xf6b   :  { %v2388_v55 = vpop.eup %2387 }
 0xf6c   :  { %772 = vrot.lane.b32.xlu0 %v2388_v55, %s2541_s10 }
 0xfde   :  { %v773_v56 = vpop.permute.xlu0 %772 }
 0xfdf   :  { %v775_v57 = vmul.f32 %v2386_v7, %v773_v56 }
 0xfe1   :  { %777 = vrot.lane.b32.xlu1 %v775_v57, %s2542_s3 }
0x1053   :  { %v778_v58 = vpop.permute.xlu1 %777 }
0x1054   :  { %780 = vst.msk [vmem:[#allocation3 + $0xa] sm:$0x3] %vm264_vm2, %v778_v58  ;;  %2209 = vmatmul.mubr.msk.f32.vlgmr.msra.gmra.mxu1 %vm161_vm3, %v778_v58 }
0x1055   :  { %2230 = vmatprep.mubr.msk.f32.mxu1 %vm161_vm3, %v996_v59  ;;  %2223 = vmatpush3.msra.mxu1 %v990_v34 }
0x1056   :  { %2224 = vmatprep.subr.mxu1 %v989_v35 }
0x1057   :  { %2225 = vmatpush3.msra.mxu1 %v989_v35 }
0x1058   :  { %2226 = vmatprep.subr.mxu1 %v988_v36 }
0x1059   :  { %2227 = vmatpush3.msra.mxu1 %v988_v36 }
0x105a   :  { %2228 = vmatprep.subr.mxu1 %v987_v37 }
0x105b   :  { %2229 = vmatpush3.msra.mxu1 %v987_v37 }
0x105c   :  { %2244 = vmatprep.subr.mxu1 %v2539_v0 }
0x1114   :  { %v850_v61 = vpop.f32.mrf.mxu1 }
0x1115   :  { %v854_v62 = vadd.f32 %v850_v61, %v781_v60 }
0x1116   :  { %v2210_v63 = vpop.f32.mrf.mxu1 }
0x1117   :  { %2389 = vtanh.f32 %v854_v62  ;;  %v2009_v2 = vmul.f32 -1.442695, %v854_v62 }
0x1119   :  { %2391 = vpow2.f32 %v2009_v2 }
0x1124   :  { %v2390_v1 = vpop.eup %2389 }
0x1125   :  { %864 = vrot.lane.b32.xlu0 %v2390_v1, %s2541_s10 }
0x1126   :  { %v2392_v3 = vpop.eup %2391 }
0x1127   :  { %v858_v6 = vadd.f32 1.0, %v2392_v3 }
0x1129   :  { %2393 = vrcp.f32 %v858_v6 }
0x1136   :  { %v2394_v9 = vpop.eup %2393 }
0x1137   :  { %v862_v12 = vmul.f32 %v2394_v9, %v769_v54 }
0x1197   :  { %v865_v10 = vpop.permute.xlu0 %864 }
0x1198   :  { %v867_v11 = vmul.f32 %v2394_v9, %v865_v10 }
0x119a   :  { %869 = vrot.lane.b32.xlu1 %v867_v11, %s2542_s3 }
0x120c   :  { %v870_v13 = vpop.permute.xlu1 %869 }
0x120d   :  { %v872_v14 = vadd.f32 %v870_v13, %v862_v12 }
0x120f   :  { %2395 = vtanh.f32 %v872_v14 }
0x121c   :  { %v2396_v15 = vpop.eup %2395 }
0x121d   :  { %875 = vrot.lane.b32.xlu0 %v2396_v15, %s2541_s10 }
0x128f   :  { %v876_v16 = vpop.permute.xlu0 %875 }
0x1290   :  { %v878_v17 = vmul.f32 %v2394_v9, %v876_v16 }
0x1292   :  { %880 = vrot.lane.b32.xlu1 %v878_v17, %s2542_s3 }
0x1304   :  { %v881_v18 = vpop.permute.xlu1 %880 }
0x1305   :  { %883 = vst.msk [vmem:[#allocation3 + $0xc] sm:$0x3] %vm264_vm2, %v881_v18  ;;  %2220 = vmatmul.mubr.msk.f32.vlgmr.msra.gmra.mxu0 %vm161_vm3, %v881_v18 }
0x1306   :  { %2241 = vmatprep.mubr.msk.f32.mxu0 %vm2540_vm0, %v2539_v0  ;;  %2234 = vmatpush3.msra.mxu0 %v2773_v38 }
0x1307   :  { %2235 = vmatprep.subr.mxu0 %v2539_v0 }
0x1308   :  { %2236 = vmatpush3.msra.mxu0 %v2775_v39 }
0x1309   :  { %2237 = vmatprep.subr.mxu0 %v2539_v0 }
0x130a   :  { %2238 = vmatpush3.msra.mxu0 %v2780_v41 }
0x130b   :  { %2239 = vmatprep.subr.mxu0 %v2539_v0 }
0x130c   :  { %2240 = vmatpush3.msra.mxu0 %v2784_v43 }
0x130d   :  { %2242 = vmatmul.mubr.f32.vlgmr.msra.gmra.mxu0 %v2539_v0  ;;  %2255 = vmatprep.subr.mxu0 %v2539_v0 }
0x130e   :  { %2256 = vmatpush3.msra.mxu0 %v2773_v38  ;;  %2263 = vmatprep.mubr.msk.f32.mxu0 %vm2540_vm0, %v2539_v0 }
0x130f   :  { %2257 = vmatprep.subr.mxu0 %v2539_v0 }
0x1310   :  { %2258 = vmatpush3.msra.mxu0 %v2775_v39 }
0x1311   :  { %2259 = vmatprep.subr.mxu0 %v2539_v0 }
0x1312   :  { %2260 = vmatpush3.msra.mxu0 %v2780_v41 }
0x1313   :  { %2261 = vmatprep.subr.mxu0 %v2539_v0 }
0x1314   :  { %2262 = vmatpush3.msra.mxu0 %v2784_v43 }
0x1315   :  { %2277 = vmatprep.subr.mxu0 %v2539_v0 }
0x13c5   :  { %v953_v20 = vpop.f32.mrf.mxu0 }
0x13c6   :  { %v957_v21 = vadd.f32 %v953_v20, %v884_v19 }
0x13c7   :  { %v2221_v22 = vpop.f32.mrf.mxu0 }
0x13c8   :  { %2397 = vtanh.f32 %v957_v21  ;;  %v2011_v24 = vmul.f32 -1.442695, %v957_v21 }
0x13ca   :  { %2399 = vpow2.f32 %v2011_v24 }
0x13cd   :  { %v1154_v46 = vpop.f32.mrf.mxu0 }
0x13cf   :  { %v2243_v4 = vpop.f32.mrf.mxu0 }
0x13d5   :  { %v2398_v23 = vpop.eup %2397 }
0x13d6   :  { %967 = vrot.lane.b32.xlu0 %v2398_v23, %s2541_s10 }
0x13d7   :  { %v2400_v25 = vpop.eup %2399 }
0x13d8   :  { %v961_v26 = vadd.f32 1.0, %v2400_v25 }
0x13da   :  { %2401 = vrcp.f32 %v961_v26 }
0x13e7   :  { %v2402_v27 = vpop.eup %2401 }
0x13e8   :  { %v965_v30 = vmul.f32 %v2402_v27, %v872_v14 }
0x1448   :  { %v968_v28 = vpop.permute.xlu0 %967 }
0x1449   :  { %v970_v29 = vmul.f32 %v2402_v27, %v968_v28 }
0x144b   :  { %972 = vrot.lane.b32.xlu1 %v970_v29, %s2542_s3 }
0x14bd   :  { %v973_v31 = vpop.permute.xlu1 %972 }
0x14be   :  { %v975_v32 = vadd.f32 %v973_v31, %v965_v30 }
0x14c0   :  { %2403 = vtanh.f32 %v975_v32 }
0x14cd   :  { %v2404_v33 = vpop.eup %2403 }
0x14ce   :  { %978 = vrot.lane.b32.xlu0 %v2404_v33, %s2541_s10 }
0x1540   :  { %v979_v40 = vpop.permute.xlu0 %978 }
0x1541   :  { %v981_v42 = vmul.f32 %v2402_v27, %v979_v40 }
0x1543   :  { %983 = vrot.lane.b32.xlu1 %v981_v42, %s2542_s3 }
0x15b5   :  { %v984_v44 = vpop.permute.xlu1 %983 }
0x15b6   :  { %986 = vst.msk [vmem:[#allocation3 + $0xe] sm:$0x3] %vm264_vm2, %v984_v44 }
0x15bd   :  { %v997_v45 = vld [vmem:[#allocation3 + $0x8] sm:$0xff] }
0x15be   :  { %2231 = vmatmul.mubr.msk.f32.vlgmr.msra.gmra.mxu1 %vm161_vm3, %v997_v45 }
0x15bf   :  { %2245 = vmatpush3.msra.mxu1 %v2773_v38  ;;  %2252 = vmatprep.mubr.msk.f32.mxu1 %vm2540_vm0, %v2539_v0 }
0x15c0   :  { %2246 = vmatprep.subr.mxu1 %v2539_v0 }
0x15c1   :  { %2247 = vmatpush3.msra.mxu1 %v2775_v39 }
0x15c2   :  { %2248 = vmatprep.subr.mxu1 %v2539_v0 }
0x15c3   :  { %2249 = vmatpush3.msra.mxu1 %v2780_v41 }
0x15c4   :  { %2250 = vmatprep.subr.mxu1 %v2539_v0 }
0x15c5   :  { %2251 = vmatpush3.msra.mxu1 %v2784_v43 }
0x15c6   :  { %2266 = vmatprep.subr.mxu1 %v2539_v0 }
0x167e   :  { %v2232_v48 = vpop.f32.mrf.mxu1 }
0x167f   :  { %v1082_v49 = vadd.f32 %v2232_v48, %v2012_v47 }
0x1680   :  { %v1076_v5 = vpop.f32.mrf.mxu1 }
0x1681   :  { %1086 = vst [vmem:[#allocation2 + $0x8] sm:$0xff] %v1082_v49  ;;  %v1077_v50 = vadd.f32 %v2012_v47, %v1076_v5 }
0x1683   :  { %1085 = vst [vmem:[#allocation2] sm:$0xff] %v1077_v50 }
0x168a   :  { %v1087_v7 = vld [vmem:[#allocation2] sm:$0x3]  ;;  %v1183_v2 = vld [vmem:[#allocation2 + $0x2] sm:$0x3]  ;;  %v1284_v24 = vld [vmem:[#allocation2 + $0x4] sm:$0x3] }
0x168b   :  { %v1158_v51 = vadd.f32 %v1154_v46, %v1087_v7  ;;  %v1385_v46 = vld [vmem:[#allocation2 + $0x6] sm:$0x3] }
0x168d   :  { %2405 = vtanh.f32 %v1158_v51  ;;  %v2015_v8 = vmul.f32 -1.442695, %v1158_v51 }
0x168f   :  { %2407 = vpow2.f32 %v2015_v8 }
0x169a   :  { %v2406_v52 = vpop.eup %2405 }
0x169b   :  { %1168 = vrot.lane.b32.xlu0 %v2406_v52, %s2541_s10 }
0x169c   :  { %v2408_v53 = vpop.eup %2407 }
0x169d   :  { %v1162_v54 = vadd.f32 1.0, %v2408_v53 }
0x169f   :  { %2409 = vrcp.f32 %v1162_v54 }
0x16ac   :  { %v2410_v55 = vpop.eup %2409 }
0x16ad   :  { %v1166_v58 = vmul.f32 0.0, %v2410_v55 }
0x170d   :  { %v1169_v56 = vpop.permute.xlu0 %1168 }
0x170e   :  { %v1171_v57 = vmul.f32 %v2410_v55, %v1169_v56 }
0x1710   :  { %1173 = vrot.lane.b32.xlu1 %v1171_v57, %s2542_s3 }
0x1782   :  { %v1174_v59 = vpop.permute.xlu1 %1173 }
0x1783   :  { %v1176_v60 = vadd.f32 %v1174_v59, %v1166_v58 }
0x1785   :  { %2411 = vtanh.f32 %v1176_v60 }
0x1792   :  { %v2412_v61 = vpop.eup %2411 }
0x1793   :  { %1179 = vrot.lane.b32.xlu0 %v2412_v61, %s2541_s10 }
0x1805   :  { %v1180_v62 = vpop.permute.xlu0 %1179 }
0x1806   :  { %v1182_v63 = vmul.f32 %v2410_v55, %v1180_v62 }
0x1808   :  { %1185 = vrot.lane.b32.xlu1 %v1182_v63, %s2542_s3 }
0x187a   :  { %v1186_v1 = vpop.permute.xlu1 %1185 }
0x187b   :  { %2253 = vmatmul.mubr.msk.f32.vlgmr.msra.gmra.mxu1 %vm161_vm3, %v1186_v1 }
0x187c   :  { %2267 = vmatpush3.msra.mxu1 %v2773_v38  ;;  %2274 = vmatprep.mubr.msk.f32.mxu1 %vm2540_vm0, %v2539_v0 }
0x187d   :  { %2268 = vmatprep.subr.mxu1 %v2539_v0 }
0x187e   :  { %2269 = vmatpush3.msra.mxu1 %v2775_v39 }
0x187f   :  { %2270 = vmatprep.subr.mxu1 %v2539_v0 }
0x1880   :  { %2271 = vmatpush3.msra.mxu1 %v2780_v41 }
0x1881   :  { %2272 = vmatprep.subr.mxu1 %v2539_v0 }
0x1882   :  { %2273 = vmatpush3.msra.mxu1 %v2784_v43 }
0x1883   :  { %2288 = vmatprep.subr.mxu1 %v2539_v0 }
0x193b   :  { %v1255_v3 = vpop.f32.mrf.mxu1 }
0x193c   :  { %v1259_v6 = vadd.f32 %v1255_v3, %v1183_v2 }
0x193d   :  { %v2254_v9 = vpop.f32.mrf.mxu1 }
0x193e   :  { %2413 = vtanh.f32 %v1259_v6  ;;  %v2017_v11 = vmul.f32 -1.442695, %v1259_v6 }
0x1940   :  { %2415 = vpow2.f32 %v2017_v11 }
0x194b   :  { %v2414_v10 = vpop.eup %2413 }
0x194c   :  { %1269 = vrot.lane.b32.xlu0 %v2414_v10, %s2541_s10 }
0x194d   :  { %v2416_v12 = vpop.eup %2415 }
0x194e   :  { %v1263_v13 = vadd.f32 1.0, %v2416_v12 }
0x1950   :  { %2417 = vrcp.f32 %v1263_v13 }
0x195d   :  { %v2418_v14 = vpop.eup %2417 }
0x195e   :  { %v1267_v17 = vmul.f32 %v2418_v14, %v1176_v60  ;;  %v1486_v60 = vld [vmem:[#allocation2 + $0x8] sm:$0x3] }
0x19be   :  { %v1270_v15 = vpop.permute.xlu0 %1269 }
0x19bf   :  { %v1272_v16 = vmul.f32 %v2418_v14, %v1270_v15 }
0x19c1   :  { %1274 = vrot.lane.b32.xlu1 %v1272_v16, %s2542_s3 }
0x1a33   :  { %v1275_v18 = vpop.permute.xlu1 %1274 }
0x1a34   :  { %v1277_v19 = vadd.f32 %v1275_v18, %v1267_v17 }
0x1a36   :  { %2419 = vtanh.f32 %v1277_v19 }
0x1a43   :  { %v2420_v20 = vpop.eup %2419 }
0x1a44   :  { %1280 = vrot.lane.b32.xlu0 %v2420_v20, %s2541_s10 }
0x1ab6   :  { %v1281_v21 = vpop.permute.xlu0 %1280 }
0x1ab7   :  { %v1283_v22 = vmul.f32 %v2418_v14, %v1281_v21 }
0x1ab9   :  { %1286 = vrot.lane.b32.xlu1 %v1283_v22, %s2542_s3 }
0x1b2b   :  { %v1287_v23 = vpop.permute.xlu1 %1286 }
0x1b2c   :  { %2264 = vmatmul.mubr.msk.f32.vlgmr.msra.gmra.mxu0 %vm161_vm3, %v1287_v23 }
0x1b2d   :  { %2278 = vmatpush3.msra.mxu0 %v2773_v38  ;;  %2285 = vmatprep.mubr.msk.f32.mxu0 %vm2540_vm0, %v2539_v0 }
0x1b2e   :  { %2279 = vmatprep.subr.mxu0 %v2539_v0 }
0x1b2f   :  { %2280 = vmatpush3.msra.mxu0 %v2775_v39 }
0x1b30   :  { %2281 = vmatprep.subr.mxu0 %v2539_v0 }
0x1b31   :  { %2282 = vmatpush3.msra.mxu0 %v2780_v41 }
0x1b32   :  { %2283 = vmatprep.subr.mxu0 %v2539_v0 }
0x1b33   :  { %2284 = vmatpush3.msra.mxu0 %v2784_v43 }
0x1b34   :  { %2299 = vmatprep.subr.mxu0 %v2539_v0 }
0x1bec   :  { %v1356_v25 = vpop.f32.mrf.mxu0 }
0x1bed   :  { %v1360_v26 = vadd.f32 %v1356_v25, %v1284_v24 }
0x1bee   :  { %v2265_v27 = vpop.f32.mrf.mxu0 }
0x1bef   :  { %2421 = vtanh.f32 %v1360_v26  ;;  %v2019_v29 = vmul.f32 -1.442695, %v1360_v26 }
0x1bf1   :  { %2423 = vpow2.f32 %v2019_v29 }
0x1bfc   :  { %v2422_v28 = vpop.eup %2421 }
0x1bfd   :  { %1370 = vrot.lane.b32.xlu0 %v2422_v28, %s2541_s10 }
0x1bfe   :  { %v2424_v30 = vpop.eup %2423 }
0x1bff   :  { %v1364_v31 = vadd.f32 1.0, %v2424_v30 }
0x1c01   :  { %2425 = vrcp.f32 %v1364_v31 }
0x1c0e   :  { %v2426_v32 = vpop.eup %2425 }
0x1c0f   :  { %v1368_v35 = vmul.f32 %v2426_v32, %v1277_v19  ;;  %v1587_v19 = vld [vmem:[#allocation2 + $0xa] sm:$0x3] }
0x1c6f   :  { %v1371_v33 = vpop.permute.xlu0 %1370 }
0x1c70   :  { %v1373_v34 = vmul.f32 %v2426_v32, %v1371_v33  ;;  %v1688_v33 = vld [vmem:[#allocation2 + $0xc] sm:$0x3] }
0x1c72   :  { %1375 = vrot.lane.b32.xlu1 %v1373_v34, %s2542_s3 }
0x1ce4   :  { %v1376_v36 = vpop.permute.xlu1 %1375 }
0x1ce5   :  { %v1378_v37 = vadd.f32 %v1376_v36, %v1368_v35 }
0x1ce7   :  { %2427 = vtanh.f32 %v1378_v37 }
0x1cf4   :  { %v2428_v40 = vpop.eup %2427 }
0x1cf5   :  { %1381 = vrot.lane.b32.xlu0 %v2428_v40, %s2541_s10 }
0x1d67   :  { %v1382_v42 = vpop.permute.xlu0 %1381 }
0x1d68   :  { %v1384_v44 = vmul.f32 %v2426_v32, %v1382_v42 }
0x1d6a   :  { %1387 = vrot.lane.b32.xlu1 %v1384_v44, %s2542_s3 }
0x1ddc   :  { %v1388_v45 = vpop.permute.xlu1 %1387 }
0x1ddd   :  { %2275 = vmatmul.mubr.msk.f32.vlgmr.msra.gmra.mxu1 %vm161_vm3, %v1388_v45 }
0x1dde   :  { %2289 = vmatpush3.msra.mxu1 %v2773_v38  ;;  %2296 = vmatprep.mubr.msk.f32.mxu1 %vm2540_vm0, %v2539_v0 }
0x1ddf   :  { %2290 = vmatprep.subr.mxu1 %v2539_v0 }
0x1de0   :  { %2291 = vmatpush3.msra.mxu1 %v2775_v39 }
0x1de1   :  { %2292 = vmatprep.subr.mxu1 %v2539_v0 }
0x1de2   :  { %2293 = vmatpush3.msra.mxu1 %v2780_v41 }
0x1de3   :  { %2294 = vmatprep.subr.mxu1 %v2539_v0 }
0x1de4   :  { %2295 = vmatpush3.msra.mxu1 %v2784_v43 }
0x1de5   :  { %2310 = vmatprep.subr.mxu1 %v2539_v0 }
0x1e9d   :  { %v1457_v4 = vpop.f32.mrf.mxu1 }
0x1e9e   :  { %v1461_v47 = vadd.f32 %v1457_v4, %v1385_v46 }
0x1e9f   :  { %v2276_v48 = vpop.f32.mrf.mxu1 }
0x1ea0   :  { %2429 = vtanh.f32 %v1461_v47  ;;  %v2021_v5 = vmul.f32 -1.442695, %v1461_v47 }
0x1ea2   :  { %2431 = vpow2.f32 %v2021_v5 }
0x1ead   :  { %v2430_v49 = vpop.eup %2429 }
0x1eae   :  { %1471 = vrot.lane.b32.xlu0 %v2430_v49, %s2541_s10 }
0x1eaf   :  { %v2432_v50 = vpop.eup %2431 }
0x1eb0   :  { %v1465_v7 = vadd.f32 1.0, %v2432_v50 }
0x1eb2   :  { %2433 = vrcp.f32 %v1465_v7 }
0x1ebf   :  { %v2434_v51 = vpop.eup %2433 }
0x1ec0   :  { %v1469_v53 = vmul.f32 %v2434_v51, %v1378_v37 }
0x1f20   :  { %v1472_v52 = vpop.permute.xlu0 %1471 }
0x1f21   :  { %v1474_v8 = vmul.f32 %v2434_v51, %v1472_v52  ;;  %v1789_v52 = vld [vmem:[#allocation2 + $0xe] sm:$0x3] }
0x1f23   :  { %1476 = vrot.lane.b32.xlu1 %v1474_v8, %s2542_s3 }
0x1f95   :  { %v1477_v54 = vpop.permute.xlu1 %1476 }
0x1f96   :  { %v1479_v55 = vadd.f32 %v1477_v54, %v1469_v53 }
0x1f98   :  { %2435 = vtanh.f32 %v1479_v55 }
0x1fa5   :  { %v2436_v56 = vpop.eup %2435 }
0x1fa6   :  { %1482 = vrot.lane.b32.xlu0 %v2436_v56, %s2541_s10 }
0x2018   :  { %v1483_v57 = vpop.permute.xlu0 %1482 }
0x2019   :  { %v1485_v58 = vmul.f32 %v2434_v51, %v1483_v57 }
0x201b   :  { %1488 = vrot.lane.b32.xlu1 %v1485_v58, %s2542_s3 }
0x208d   :  { %v1489_v59 = vpop.permute.xlu1 %1488 }
0x208e   :  { %2286 = vmatmul.mubr.msk.f32.vlgmr.msra.gmra.mxu0 %vm161_vm3, %v1489_v59 }
0x208f   :  { %2300 = vmatpush3.msra.mxu0 %v2773_v38  ;;  %2307 = vmatprep.mubr.msk.f32.mxu0 %vm2540_vm0, %v2539_v0 }
0x2090   :  { %2301 = vmatprep.subr.mxu0 %v2539_v0 }
0x2091   :  { %2302 = vmatpush3.msra.mxu0 %v2775_v39 }
0x2092   :  { %2303 = vmatprep.subr.mxu0 %v2539_v0 }
0x2093   :  { %2304 = vmatpush3.msra.mxu0 %v2780_v41 }
0x2094   :  { %2305 = vmatprep.subr.mxu0 %v2539_v0 }
0x2095   :  { %2306 = vmatpush3.msra.mxu0 %v2784_v43 }
0x2096   :  { %2321 = vmatprep.subr.mxu0 %v2539_v0 }
0x214e   :  { %v1558_v61 = vpop.f32.mrf.mxu0 }
0x214f   :  { %v1562_v62 = vadd.f32 %v1558_v61, %v1486_v60 }
0x2150   :  { %v2287_v63 = vpop.f32.mrf.mxu0 }
0x2151   :  { %2437 = vtanh.f32 %v1562_v62  ;;  %v2023_v2 = vmul.f32 -1.442695, %v1562_v62 }
0x2153   :  { %2439 = vpow2.f32 %v2023_v2  ;;  %v1893_v2 = vld [vmem:[%s2936_s7 + $0x18] sm:$0xff] }
0x215e   :  { %v2438_v1 = vpop.eup %2437 }
0x215f   :  { %1572 = vrot.lane.b32.xlu0 %v2438_v1, %s2541_s10 }
0x2160   :  { %v2440_v3 = vpop.eup %2439 }
0x2161   :  { %v1566_v6 = vadd.f32 1.0, %v2440_v3  ;;  %v1892_v3 = vld [vmem:[%s2936_s7 + $0x10] sm:$0xff] }
0x2163   :  { %2441 = vrcp.f32 %v1566_v6  ;;  %v1891_v6 = vld [vmem:[%s2936_s7 + $0x8] sm:$0xff] }
0x2170   :  { %v2442_v9 = vpop.eup %2441 }
0x2171   :  { %v1570_v12 = vmul.f32 %v2442_v9, %v1479_v55 }
0x21d1   :  { %v1573_v10 = vpop.permute.xlu0 %1572 }
0x21d2   :  { %v1575_v11 = vmul.f32 %v2442_v9, %v1573_v10 }
0x21d4   :  { %1577 = vrot.lane.b32.xlu1 %v1575_v11, %s2542_s3 }
0x2246   :  { %v1578_v13 = vpop.permute.xlu1 %1577 }
0x2247   :  { %v1580_v14 = vadd.f32 %v1578_v13, %v1570_v12 }
0x2249   :  { %2443 = vtanh.f32 %v1580_v14 }
0x2256   :  { %v2444_v15 = vpop.eup %2443 }
0x2257   :  { %1583 = vrot.lane.b32.xlu0 %v2444_v15, %s2541_s10 }
0x22c9   :  { %v1584_v16 = vpop.permute.xlu0 %1583 }
0x22ca   :  { %v1586_v17 = vmul.f32 %v2442_v9, %v1584_v16  ;;  %v1890_v9 = vld [vmem:[%s2936_s7] sm:$0xff]  ;;  %s1984_s7 = sshll.u32 %s2543_s27, 4  ;;  %s1985_s7 = int_to_ptr.vmem [resolvable:$true] %s1984_s7 }
0x22cb   :  { %s2509_s28 = scalar_lea.vmem %s1985_s7, 32  ;;  %p2514_p11 = scmp.lt.s32.totalorder %s1985_s7, %s1985_s7 }
0x22cc   :  { %1589 = vrot.lane.b32.xlu1 %v1586_v17, %s2542_s3  ;;  %p2510_p10 = scmp.ne.s32.totalorder %s1985_s7, %s2509_s28  ;;  %p2515_p12 = scmp.lt.s32.totalorder %s2509_s28, %s2509_s28 }
0x22ce   :  { %p2516_p13 = por %p2515_p12, %p2514_p11 }
0x22d0   :  { %p2517_p0 = pnand %p2516_p13, %p2510_p10 }
0x233e   :  { %v1590_v18 = vpop.permute.xlu1 %1589 }
0x233f   :  { %2297 = vmatmul.mubr.msk.f32.vlgmr.msra.gmra.mxu1 %vm161_vm3, %v1590_v18 }
0x2340   :  { %2311 = vmatpush3.msra.mxu1 %v2773_v38  ;;  %2318 = vmatprep.mubr.msk.f32.mxu1 %vm2540_vm0, %v2539_v0 }
0x2341   :  { %2312 = vmatprep.subr.mxu1 %v2539_v0 }
0x2342   :  { %2313 = vmatpush3.msra.mxu1 %v2775_v39 }
0x2343   :  { %2314 = vmatprep.subr.mxu1 %v2539_v0 }
0x2344   :  { %2315 = vmatpush3.msra.mxu1 %v2780_v41 }
0x2345   :  { %2316 = vmatprep.subr.mxu1 %v2539_v0 }
0x2346   :  { %2317 = vmatpush3.msra.mxu1 %v2784_v43 }
0x23ff   :  { %v1659_v20 = vpop.f32.mrf.mxu1 }
0x2400   :  { %v1663_v21 = vadd.f32 %v1659_v20, %v1587_v19 }
0x2401   :  { %v2298_v22 = vpop.f32.mrf.mxu1 }
0x2402   :  { %2445 = vtanh.f32 %v1663_v21  ;;  %v2025_v23 = vmul.f32 -1.442695, %v1663_v21 }
0x2404   :  { %2447 = vpow2.f32 %v2025_v23 }
0x240f   :  { %v2446_v38 = vpop.eup %2445 }
0x2410   :  { %1673 = vrot.lane.b32.xlu0 %v2446_v38, %s2541_s10 }
0x2411   :  { %v2448_v24 = vpop.eup %2447 }
0x2412   :  { %v1667_v39 = vadd.f32 1.0, %v2448_v24 }
0x2414   :  { %2449 = vrcp.f32 %v1667_v39 }
0x2421   :  { %v2450_v25 = vpop.eup %2449 }
0x2422   :  { %v1671_v27 = vmul.f32 %v2450_v25, %v1580_v14  ;;  %v2030_v14 = vld [vmem:[%s2937_s8] ss:$0 sm:$0xff] }
0x2482   :  { %v1674_v26 = vpop.permute.xlu0 %1673 }
0x2483   :  { %v1676_v41 = vmul.f32 %v2450_v25, %v1674_v26 }
0x2485   :  { %1678 = vrot.lane.b32.xlu1 %v1676_v41, %s2542_s3 }
0x24f7   :  { %v1679_v43 = vpop.permute.xlu1 %1678 }
0x24f8   :  { %v1681_v28 = vadd.f32 %v1679_v43, %v1671_v27 }
0x24fa   :  { %2451 = vtanh.f32 %v1681_v28 }
0x2507   :  { %v2452_v29 = vpop.eup %2451 }
0x2508   :  { %1684 = vrot.lane.b32.xlu0 %v2452_v29, %s2541_s10 }
0x257a   :  { %v1685_v30 = vpop.permute.xlu0 %1684 }
0x257b   :  { %v1687_v31 = vmul.f32 %v2450_v25, %v1685_v30 }
0x257d   :  { %1690 = vrot.lane.b32.xlu1 %v1687_v31, %s2542_s3 }
0x25ef   :  { %v1691_v32 = vpop.permute.xlu1 %1690 }
0x25f0   :  { %2308 = vmatmul.mubr.msk.f32.vlgmr.msra.gmra.mxu0 %vm161_vm3, %v1691_v32 }
0x25f1   :  { %2329 = vmatprep.mubr.msk.f32.mxu0 %vm2540_vm0, %v2539_v0  ;;  %2322 = vmatpush3.msra.mxu0 %v1893_v2 }
0x25f2   :  { %2323 = vmatprep.subr.mxu0 %v2539_v0 }
0x25f3   :  { %2324 = vmatpush3.msra.mxu0 %v1892_v3 }
0x25f4   :  { %2325 = vmatprep.subr.mxu0 %v2539_v0 }
0x25f5   :  { %2326 = vmatpush3.msra.mxu0 %v1891_v6 }
0x25f6   :  { %2327 = vmatprep.subr.mxu0 %v2539_v0 }
0x25f7   :  { %2328 = vmatpush3.msra.mxu0 %v1890_v9 }
0x26b0   :  { %v1760_v34 = vpop.f32.mrf.mxu0 }
0x26b1   :  { %v1764_v35 = vadd.f32 %v1760_v34, %v1688_v33 }
0x26b2   :  { %v2309_v36 = vpop.f32.mrf.mxu0 }
0x26b3   :  { %2453 = vtanh.f32 %v1764_v35  ;;  %v2027_v40 = vmul.f32 -1.442695, %v1764_v35 }
0x26b5   :  { %2455 = vpow2.f32 %v2027_v40 }
0x26c0   :  { %v2454_v37 = vpop.eup %2453 }
0x26c1   :  { %1774 = vrot.lane.b32.xlu0 %v2454_v37, %s2541_s10 }
0x26c2   :  { %v2456_v42 = vpop.eup %2455 }
0x26c3   :  { %v1768_v44 = vadd.f32 1.0, %v2456_v42 }
0x26c5   :  { %2457 = vrcp.f32 %v1768_v44 }
0x26d2   :  { %v2458_v45 = vpop.eup %2457 }
0x26d3   :  { %v1772_v47 = vmul.f32 %v2458_v45, %v1681_v28 }
0x2733   :  { %v1775_v46 = vpop.permute.xlu0 %1774 }
0x2734   :  { %v1777_v4 = vmul.f32 %v2458_v45, %v1775_v46 }
0x2736   :  { %1779 = vrot.lane.b32.xlu1 %v1777_v4, %s2542_s3 }
0x27a8   :  { %v1780_v48 = vpop.permute.xlu1 %1779 }
0x27a9   :  { %v1782_v49 = vadd.f32 %v1780_v48, %v1772_v47 }
0x27ab   :  { %2459 = vtanh.f32 %v1782_v49 }
0x27b8   :  { %v2460_v5 = vpop.eup %2459 }
0x27b9   :  { %1785 = vrot.lane.b32.xlu0 %v2460_v5, %s2541_s10 }
0x282b   :  { %v1786_v50 = vpop.permute.xlu0 %1785 }
0x282c   :  { %v1788_v7 = vmul.f32 %v2458_v45, %v1786_v50 }
0x282e   :  { %1791 = vrot.lane.b32.xlu1 %v1788_v7, %s2542_s3 }
0x28a0   :  { %v1792_v51 = vpop.permute.xlu1 %1791 }
0x28a1   :  { %2319 = vmatmul.mubr.msk.f32.vlgmr.msra.gmra.mxu1 %vm161_vm3, %v1792_v51 }
0x2961   :  { %v1861_v8 = vpop.f32.mrf.mxu1 }
0x2962   :  { %v1865_v53 = vadd.f32 %v1861_v8, %v1789_v52 }
0x2963   :  { %v2320_v54 = vpop.f32.mrf.mxu1 }
0x2964   :  { %2461 = vtanh.f32 %v1865_v53  ;;  %v2029_v56 = vmul.f32 -1.442695, %v1865_v53 }
0x2966   :  { %2463 = vpow2.f32 %v2029_v56 }
0x2971   :  { %v2462_v55 = vpop.eup %2461 }
0x2972   :  { %1875 = vrot.lane.b32.xlu0 %v2462_v55, %s2541_s10 }
0x2973   :  { %v2464_v57 = vpop.eup %2463 }
0x2974   :  { %v1869_v58 = vadd.f32 1.0, %v2464_v57 }
0x2976   :  { %2465 = vrcp.f32 %v1869_v58 }
0x2983   :  { %v2466_v59 = vpop.eup %2465 }
0x2984   :  { %v1873_v62 = vmul.f32 %v2466_v59, %v1782_v49 }
0x29e4   :  { %v1876_v60 = vpop.permute.xlu0 %1875 }
0x29e5   :  { %v1878_v61 = vmul.f32 %v2466_v59, %v1876_v60 }
0x29e7   :  { %1880 = vrot.lane.b32.xlu1 %v1878_v61, %s2542_s3 }
0x2a59   :  { %v1881_v63 = vpop.permute.xlu1 %1880 }
0x2a5a   :  { %v1883_v1 = vadd.f32 %v1881_v63, %v1873_v62 }
0x2a5c   :  { %2467 = vtanh.f32 %v1883_v1 }
0x2a69   :  { %v2468_v10 = vpop.eup %2467 }
0x2a6a   :  { %1886 = vrot.lane.b32.xlu0 %v2468_v10, %s2541_s10 }
0x2adc   :  { %v1887_v11 = vpop.permute.xlu0 %1886 }
0x2add   :  { %v1889_v12 = vmul.f32 %v2466_v59, %v1887_v11 }
0x2adf   :  { %1902 = vrot.lane.b32.xlu1 %v1889_v12, %s2542_s3 }
0x2b51   :  { %v1903_v13 = vpop.permute.xlu1 %1902 }
0x2b52   :  { %2330 = vmatmul.mubr.msk.f32.vlgmr.msra.gmra.mxu0 %vm161_vm3, %v1903_v13 }
0x2c12   :  { %v1972_v15 = vpop.f32.mrf.mxu0 }
0x2c13   :  { %v1973_v0 = vadd.f32 %v2030_v14, %v1972_v15 }
0x2c14   :  { %v2331_v16 = vpop.f32.mrf.mxu0 }
0x2c15   :  { %1977 = vst.msk [vmem:[#allocation9] sm:$0x3] %vm1976_vm4, %v1973_v0 }
0x2c16   :  { %2520 = shalt.err (!%p2517_p0)
}
0x2c17   :  { %1987 = dma.vmem_to_hbm [thread:$0]  %s1985_s7, 32, %s2938_s9, [#allocation6]  }
0x2c18   :  { %2533 = dma.done.wait [#allocation6], 32  }
0x2c19   :  { %2534 = vsyncadd [#allocation6], 4294967264 }
0x2c1a   :  { %1991 = vsyncpa [#allocation5], 1 }
0x2c1b   :  { %1992 = vsyncpa [#allocation8], 1 }
0x2c1c   :  { %1993 = vsyncpa [#allocation6], 1 }

</bundles_post_ra>
